<compile_context>
chip_gen: v7x
topology: tpu7x:2x2x1
jax: 0.10.0
libtpu: 0.0.40
codegen_flags: <defaults>
</compile_context>

<pallas_src>
import functools

import jax
import jax.numpy as jnp
from jax import lax
from jax.experimental import pallas as pl
from jax.experimental.pallas import tpu as pltpu

EPS = 1e-5          # PyTorch GroupNorm default eps
NEG_SLOPE = 0.2     # LeakyReLU negative slope


# --------------------------- kernel-side helpers ---------------------------
def _gn_lrelu(y, gamma, beta, *, relu=True):
    """GroupNorm(num_groups=1) + optional LeakyReLU, single traversal.

    y: (C, HW); gamma/beta: (C, 1).  Lane-axis partial reductions first (XLU)
    then a tiny (C, 1) finish; var = E[y^2] - mean^2 clamped at 0; the affine
    transform is folded into one FMA.
    """
    nel = float(y.shape[0] * y.shape[1])
    row_s = jnp.sum(y, axis=-1, keepdims=True)        # (C, 1)
    row_ss = jnp.sum(y * y, axis=-1, keepdims=True)   # (C, 1)
    mean = jnp.sum(row_s) * (1.0 / nel)
    var = jnp.sum(row_ss) * (1.0 / nel) - mean * mean
    var = jnp.maximum(var, 0.0)                       # guard catastrophic cancel
    inv = lax.rsqrt(var + EPS)
    scale = gamma * inv                               # (C, 1)
    shift = beta - mean * scale                       # (C, 1)
    y = y * scale + shift
    if relu:
        y = jnp.where(y > 0, y, NEG_SLOPE * y)
    return y


def _matmul_1x1(wt, x, *, use_mxu):
    """wt: (Co, K) @ x: (K, HW) -> (Co, HW), f32 result.

    MXU path (bf16 operands, f32 accumulation) only when both dims occupy a
    reasonable fraction of the array; otherwise unrolled VPU broadcast-FMAs on
    the lane-dense HW axis.
    """
    if use_mxu:
        return jnp.dot(wt.astype(jnp.bfloat16), x.astype(jnp.bfloat16),
                       preferred_element_type=jnp.float32)
    wt = wt.astype(jnp.float32)
    K = wt.shape[1]
    acc = wt[:, 0:1] * x[0:1, :]
    for c in range(1, K):
        acc = acc + wt[:, c:c + 1] * x[c:c + 1, :]
    return acc


def _dw3x3_reflect(y, wd, bd, masks, H, W):
    """Depthwise 3x3 conv, reflect pad 1, on the flattened (C, H*W) tile.

    Column taps are (re)built lazily per j-iteration (the extra roll is XLU,
    near-free) and the 9 terms accumulate as a balanced tree so only ~5
    full-size temps are live at once.
    """
    HW = H * W
    is_w0, is_wl, is_h0, is_hl = masks
    partials = []
    for j in range(3):                                    # kw = j (dw = j - 1)
        if j == 0:
            v = pltpu.roll(y, shift=1, axis=1)            # value at (h, w-1)
            alt = pltpu.roll(y, shift=HW - 1, axis=1)     # value at (h, w+1)
            cj = jnp.where(is_w0, alt, v)                 # reflect: w=-1 -> w=1
        elif j == 2:
            v = pltpu.roll(y, shift=HW - 1, axis=1)       # value at (h, w+1)
            alt = pltpu.roll(y, shift=1, axis=1)          # value at (h, w-1)
            cj = jnp.where(is_wl, alt, v)                 # reflect: w=W -> w=W-2
        else:
            cj = y
        r_m1 = pltpu.roll(cj, shift=W, axis=1)            # (h-1, .)
        r_p1 = pltpu.roll(cj, shift=HW - W, axis=1)       # (h+1, .)
        r_m1f = jnp.where(is_h0, r_p1, r_m1)              # reflect: h=-1 -> h=1
        r_p1f = jnp.where(is_hl, r_m1, r_p1)              # reflect: h=H -> h=H-2
        partials.append(r_m1f * wd[:, j:j + 1]            # k = 0*3 + j
                        + cj * wd[:, 3 + j:4 + j]         # k = 1*3 + j
                        + r_p1f * wd[:, 6 + j:7 + j])     # k = 2*3 + j
    return (partials[0] + partials[2]) + (partials[1] + bd)


def _inverted_res_block_kernel(x_ref, mask_ref, w1t_ref, w3t_ref, p_ref, o_ref,
                               *, Nb, use_res, H, W, Cb, Cout,
                               mxu_expand, mxu_project):
    HW = H * W

    # Host-precomputed border bitmask, shared by every sample in this step.
    m = mask_ref[...]                                    # (1, HW) int32
    masks = ((m & 1) != 0, (m & 2) != 0, (m & 4) != 0, (m & 8) != 0)

    # Packed per-channel params.  Columns: 0..8 depthwise taps, 9 bd,
    # 10..13 g1,b1,g2,b2, 14..15 g3,b3.  Each (C, 1) slice broadcasts on lanes.
    p = p_ref[...].astype(jnp.float32)                   # (Cmax, 16)
    wd = p[:Cb, 0:9]
    bd = p[:Cb, 9:10]
    g1, b1 = p[:Cb, 10:11], p[:Cb, 11:12]
    g2, b2 = p[:Cb, 12:13], p[:Cb, 13:14]
    g3, b3 = p[:Cout, 14:15], p[:Cout, 15:16]

    w1t = w1t_ref[...]                                   # (Cb, Cin)
    w3t = w3t_ref[...]                                   # (Cout, Cb)

    for s in range(Nb):                                  # static unroll over samples
        x = x_ref[s].astype(jnp.float32)                 # (Cin, HW)

        # expand: 1x1 conv (bias=False) + GroupNorm(1) + LeakyReLU(0.2)
        y = _matmul_1x1(w1t, x, use_mxu=mxu_expand)      # (Cb, HW)
        y = _gn_lrelu(y, g1, b1)

        # depthwise 3x3 conv, reflect pad 1, bias=True + GN + LeakyReLU
        z = _dw3x3_reflect(y, wd, bd, masks, H, W)
        z = _gn_lrelu(z, g2, b2)

        # project: 1x1 conv (bias=False) + GroupNorm(1), no activation
        o = _matmul_1x1(w3t, z, use_mxu=mxu_project)     # (Cout, HW)
        o = _gn_lrelu(o, g3, b3, relu=False)

        if use_res:                                      # in_ch == out_ch
            o = o + x
        o_ref[s] = o.astype(o_ref.dtype)


# ------------------------------ host-side wrapper ------------------------------
def _vmem_budget_bytes():
    """Per-generation VMEM cap with headroom (v5e/v6e 128 MiB, v7x 64 MiB)."""
    cap = 64 * 1024 * 1024                               # conservative default
    try:
        info = pltpu.get_tpu_info()
        cap = int(getattr(info, "vmem_capacity_bytes", cap))
    except Exception:
        pass
    return max(cap - 12 * 1024 * 1024, 24 * 1024 * 1024)


def _use_mxu(co, k):
    """MXU only when both dims occupy a reasonable fraction of the array;
    very deep K always goes to the MXU to bound VPU unrolling."""
    return (k >= 64 and co >= 64) or k > 256


def _choose_samples_per_step(N, bytes_per_sample, budget):
    """Batch Nb samples per grid step to amortize the ~0.35us per-step
    overhead, keeping >= 2 grid steps (v7x megacore) when N >= 2 and staying
    within ~half the VMEM budget."""
    if N <= 1:
        return 1
    cap = max(1, int((budget // 2) // max(bytes_per_sample, 1)))
    target = 4 * 1024 * 1024
    best = 1
    for nb in range(1, N + 1):
        if N % nb != 0 or nb > cap:
            continue
        if N // nb < 2:
            continue
        best = nb
        if nb * bytes_per_sample >= target:
            break
    return best


def inverted_res_block(x_nchw, params):
    """params: w1 (Cin,Cb), g1/b1 (1,Cb), wd (9,Cb), bd/g2/b2 (1,Cb),
               w3 (Cb,Cout), g3/b3 (1,Cout)."""
    N, Cin, H, W = x_nchw.shape
    assert H >= 2 and W >= 2, "ReflectionPad2d(1) requires H, W >= 2"
    Cb = params['w1'].shape[1]
    Cout = params['w3'].shape[1]
    Cmax = max(Cb, Cout)
    HW = H * W
    use_res = (Cin == Cout)
    # TODO(synk): when H*W is not a multiple of 128, pad the lane axis (and mask
    # the pad out of the GN sums) to avoid masked partial stores on the output.

    # (N, C, H, W) -> (N, C, H*W): contiguous reshape, no HBM transpose.
    x = x_nchw.reshape(N, Cin, HW)

    # Transposed 1x1-conv weights so results come out lane-dense as (C, HW).
    # bf16 on the host only when the MXU path will actually be used.
    mxu_expand = _use_mxu(Cb, Cin)
    mxu_project = _use_mxu(Cout, Cb)
    w1t = jnp.transpose(params['w1']).astype(
        jnp.bfloat16 if mxu_expand else jnp.float32)     # (Cb, Cin)
    w3t = jnp.transpose(params['w3']).astype(
        jnp.bfloat16 if mxu_project else jnp.float32)    # (Cout, Cb)

    # Pack all per-channel vectors into one (Cmax, 16) matrix (channels on
    # sublanes, so every column broadcasts along the lane / H*W axis in-kernel).
    def colvec(v):
        v = v.astype(jnp.float32)
        return jnp.pad(v, (0, Cmax - v.shape[0]))
    cols = [colvec(params['wd'][k]) for k in range(9)]
    cols += [colvec(params['bd'][0]),
             colvec(params['g1'][0]), colvec(params['b1'][0]),
             colvec(params['g2'][0]), colvec(params['b2'][0]),
             colvec(params['g3'][0]), colvec(params['b3'][0])]
    pvec = jnp.stack(cols, axis=1)                       # (Cmax, 16)

    # Precomputed reflect-pad border bitmask (identical for every grid step):
    # bit0 = w==0, bit1 = w==W-1, bit2 = h==0, bit3 = h==H-1.
    flat = jnp.arange(HW, dtype=jnp.int32)
    col = flat % W
    mask = ((col == 0).astype(jnp.int32)
            | ((col == W - 1).astype(jnp.int32) << 1)
            | ((flat < W).astype(jnp.int32) << 2)
            | ((flat >= (H - 1) * W).astype(jnp.int32) << 3))
    mask = mask.reshape(1, HW)

    # VMEM sizing: generation-aware budget, per-step footprint estimate.
    budget = _vmem_budget_bytes()
    itemsize = jnp.dtype(x_nchw.dtype).itemsize
    per_sample_interm = 4 * HW * (Cin + Cout + 6 * Cb)   # f32 live set in-kernel
    per_sample_io = itemsize * HW * (Cin + Cout)         # one in + one out tile
    per_sample_bytes = per_sample_interm + 2 * per_sample_io
    nb = _choose_samples_per_step(N, per_sample_bytes, budget)
    need = nb * per_sample_bytes + (4 << 20)
    vmem_limit = int(min(max(need, 32 << 20), budget))
    # TODO(synk): if a single sample's intermediates exceed the v7x budget
    # (very large H*W*Cb), switch the (Cb,HW) temps to bf16 (keeping GN sums
    # and the depthwise accumulator in f32) or stream GN over spatial tiles.

    kernel = functools.partial(
        _inverted_res_block_kernel,
        Nb=nb, use_res=use_res, H=H, W=W, Cb=Cb, Cout=Cout,
        mxu_expand=mxu_expand, mxu_project=mxu_project)

    out = pl.pallas_call(
        kernel,
        out_shape=jax.ShapeDtypeStruct((N, Cout, HW), x_nchw.dtype),
        grid=(N // nb,),
        in_specs=[
            pl.BlockSpec((nb, Cin, HW), lambda n: (n, 0, 0)),
            pl.BlockSpec(mask.shape, lambda n: (0, 0)),
            pl.BlockSpec(w1t.shape, lambda n: (0, 0)),
            pl.BlockSpec(w3t.shape, lambda n: (0, 0)),
            pl.BlockSpec(pvec.shape, lambda n: (0, 0)),
        ],
        out_specs=pl.BlockSpec((nb, Cout, HW), lambda n: (n, 0, 0)),
        compiler_params=pltpu.CompilerParams(
            dimension_semantics=("parallel",),
            vmem_limit_bytes=vmem_limit),
    )(x, mask, w1t, w3t, pvec)
    return out.reshape(N, Cout, H, W)


# ----------------------------- pure-JAX reference -----------------------------
def _ref_group_norm(x, gamma, beta):                     # x: (N, C, H, W)
    mean = jnp.mean(x, axis=(1, 2, 3), keepdims=True)
    var = jnp.mean((x - mean) ** 2, axis=(1, 2, 3), keepdims=True)
    xh = (x - mean) / jnp.sqrt(var + EPS)
    return xh * gamma[None, :, None, None] + beta[None, :, None, None]


def _ref_forward(x, params):
    Cin = x.shape[1]
    Cb = params['w1'].shape[1]
    Cout = params['w3'].shape[1]
    dn = ('NCHW', 'OIHW', 'NCHW')
    # expand 1x1
    w1 = params['w1'].T[:, :, None, None]
    y = lax.conv_general_dilated(x, w1, (1, 1), 'VALID', dimension_numbers=dn)
    y = _ref_group_norm(y, params['g1'][0], params['b1'][0])
    y = jnp.where(y > 0, y, NEG_SLOPE * y)
    # depthwise 3x3, reflect pad 1
    yp = jnp.pad(y, ((0, 0), (0, 0), (1, 1), (1, 1)), mode='reflect')
    wd = params['wd'].reshape(3, 3, Cb).transpose(2, 0, 1)[:, None, :, :]
    z = lax.conv_general_dilated(yp, wd, (1, 1), 'VALID', dimension_numbers=dn,
                                 feature_group_count=Cb)
    z = z + params['bd'][0][None, :, None, None]
    z = _ref_group_norm(z, params['g2'][0], params['b2'][0])
    z = jnp.where(z > 0, z, NEG_SLOPE * z)
    # project 1x1
    w3 = params['w3'].T[:, :, None, None]
    o = lax.conv_general_dilated(z, w3, (1, 1), 'VALID', dimension_numbers=dn)
    o = _ref_group_norm(o, params['g3'][0], params['b3'][0])
    if Cin == Cout:
        o = o + x
    return o


if __name__ == "__main__":
    N, Cin, H, W = 2, 4, 16, 16
    expansion_ratio = 2
    Cout = Cin                                  # use_res_connect path
    Cb = int(round(Cin * expansion_ratio))      # bottleneck = 8

    keys = jax.random.split(jax.random.PRNGKey(0), 11)
    params = {
        'w1': 0.2 * jax.random.normal(keys[0], (Cin, Cb), jnp.float32),
        'g1': 1.0 + 0.1 * jax.random.normal(keys[1], (1, Cb), jnp.float32),
        'b1': 0.1 * jax.random.normal(keys[2], (1, Cb), jnp.float32),
        'wd': 0.2 * jax.random.normal(keys[3], (9, Cb), jnp.float32),
        'bd': 0.1 * jax.random.normal(keys[4], (1, Cb), jnp.float32),
        'g2': 1.0 + 0.1 * jax.random.normal(keys[5], (1, Cb), jnp.float32),
        'b2': 0.1 * jax.random.normal(keys[6], (1, Cb), jnp.float32),
        'w3': 0.2 * jax.random.normal(keys[7], (Cb, Cout), jnp.float32),
        'g3': 1.0 + 0.1 * jax.random.normal(keys[8], (1, Cout), jnp.float32),
        'b3': 0.1 * jax.random.normal(keys[9], (1, Cout), jnp.float32),
    }
    x = jax.random.normal(keys[10], (N, Cin, H, W), jnp.float32)

    out = jax.block_until_ready(inverted_res_block(x, params))
    ref = _ref_forward(x, params)
    assert out.shape == (N, Cout, H, W)
    err = float(jnp.max(jnp.abs(out - ref)))
    assert jnp.allclose(out, ref, rtol=1e-3, atol=1e-3), f"max abs err {err}"
    print("KERNEL_OK")
</pallas_src>

<mosaic_0001>
module attributes {stable_mosaic.version = 11 : i64} {
  func.func @_inverted_res_block_kernel(%arg0: i32, %arg1: memref<1x4x256xf32, #tpu.memory_space<vmem>>, %arg2: memref<1x256xi32, #tpu.memory_space<vmem>>, %arg3: memref<8x4xf32, #tpu.memory_space<vmem>>, %arg4: memref<4x8xf32, #tpu.memory_space<vmem>>, %arg5: memref<8x16xf32, #tpu.memory_space<vmem>>, %arg6: memref<1x4x256xf32, #tpu.memory_space<vmem>>) attributes {dimension_semantics = [#tpu.dimension_semantics<parallel>], iteration_bounds = array<i64: 2>, scalar_prefetch = 0 : i64, scratch_operands = 0 : i64, tpu.core_type = #tpu.core_type<tc>, window_params = [{transform_indices = @transform_0, window_bounds = array<i64: 1, 4, 256>}, {pipeline_mode = #tpu.pipeline_mode<synchronous>, transform_indices = @transform_1, window_bounds = array<i64: 1, 256>}, {pipeline_mode = #tpu.pipeline_mode<synchronous>, transform_indices = @transform_2, window_bounds = array<i64: 8, 4>}, {pipeline_mode = #tpu.pipeline_mode<synchronous>, transform_indices = @transform_3, window_bounds = array<i64: 4, 8>}, {pipeline_mode = #tpu.pipeline_mode<synchronous>, transform_indices = @transform_4, window_bounds = array<i64: 8, 16>}, {transform_indices = @transform_5, window_bounds = array<i64: 1, 4, 256>}]} {
    %c0 = arith.constant 0 : index
    %c0_0 = arith.constant 0 : index
    %0 = vector.load %arg2[%c0, %c0_0] : memref<1x256xi32, #tpu.memory_space<vmem>>, vector<1x256xi32>
    %c1_i32 = arith.constant 1 : i32
    %1 = vector.broadcast %c1_i32 : i32 to vector<1x256xi32>
    %2 = arith.andi %0, %1 : vector<1x256xi32>
    %c0_i32 = arith.constant 0 : i32
    %3 = vector.broadcast %c0_i32 : i32 to vector<1x256xi32>
    %4 = arith.cmpi ne, %2, %3 : vector<1x256xi32>
    %c2_i32 = arith.constant 2 : i32
    %5 = vector.broadcast %c2_i32 : i32 to vector<1x256xi32>
    %6 = arith.andi %0, %5 : vector<1x256xi32>
    %c0_i32_1 = arith.constant 0 : i32
    %7 = vector.broadcast %c0_i32_1 : i32 to vector<1x256xi32>
    %8 = arith.cmpi ne, %6, %7 : vector<1x256xi32>
    %c4_i32 = arith.constant 4 : i32
    %9 = vector.broadcast %c4_i32 : i32 to vector<1x256xi32>
    %10 = arith.andi %0, %9 : vector<1x256xi32>
    %c0_i32_2 = arith.constant 0 : i32
    %11 = vector.broadcast %c0_i32_2 : i32 to vector<1x256xi32>
    %12 = arith.cmpi ne, %10, %11 : vector<1x256xi32>
    %c8_i32 = arith.constant 8 : i32
    %13 = vector.broadcast %c8_i32 : i32 to vector<1x256xi32>
    %14 = arith.andi %0, %13 : vector<1x256xi32>
    %c0_i32_3 = arith.constant 0 : i32
    %15 = vector.broadcast %c0_i32_3 : i32 to vector<1x256xi32>
    %16 = arith.cmpi ne, %14, %15 : vector<1x256xi32>
    %c0_4 = arith.constant 0 : index
    %c0_5 = arith.constant 0 : index
    %17 = vector.load %arg5[%c0_4, %c0_5] : memref<8x16xf32, #tpu.memory_space<vmem>>, vector<8x16xf32>
    %18 = vector.extract_strided_slice %17 {offsets = [0, 0], sizes = [8, 9], strides = [1, 1]} : vector<8x16xf32> to vector<8x9xf32>
    %19 = vector.extract_strided_slice %17 {offsets = [0, 9], sizes = [8, 1], strides = [1, 1]} : vector<8x16xf32> to vector<8x1xf32>
    %20 = vector.extract_strided_slice %17 {offsets = [0, 10], sizes = [8, 1], strides = [1, 1]} : vector<8x16xf32> to vector<8x1xf32>
    %21 = vector.extract_strided_slice %17 {offsets = [0, 11], sizes = [8, 1], strides = [1, 1]} : vector<8x16xf32> to vector<8x1xf32>
    %22 = vector.extract_strided_slice %17 {offsets = [0, 12], sizes = [8, 1], strides = [1, 1]} : vector<8x16xf32> to vector<8x1xf32>
    %23 = vector.extract_strided_slice %17 {offsets = [0, 13], sizes = [8, 1], strides = [1, 1]} : vector<8x16xf32> to vector<8x1xf32>
    %24 = vector.extract_strided_slice %17 {offsets = [0, 14], sizes = [4, 1], strides = [1, 1]} : vector<8x16xf32> to vector<4x1xf32>
    %25 = vector.extract_strided_slice %17 {offsets = [0, 15], sizes = [4, 1], strides = [1, 1]} : vector<8x16xf32> to vector<4x1xf32>
    %c0_6 = arith.constant 0 : index
    %c0_7 = arith.constant 0 : index
    %26 = vector.load %arg3[%c0_6, %c0_7] : memref<8x4xf32, #tpu.memory_space<vmem>>, vector<8x4xf32>
    %c0_8 = arith.constant 0 : index
    %c0_9 = arith.constant 0 : index
    %27 = vector.load %arg4[%c0_8, %c0_9] : memref<4x8xf32, #tpu.memory_space<vmem>>, vector<4x8xf32>
    %c0_10 = arith.constant 0 : index
    %c0_11 = arith.constant 0 : index
    %c0_12 = arith.constant 0 : index
    %28 = vector.load %arg1[%c0_10, %c0_11, %c0_12] : memref<1x4x256xf32, #tpu.memory_space<vmem>>, vector<1x4x256xf32>
    %29 = vector.shape_cast %28 : vector<1x4x256xf32> to vector<4x256xf32>
    %30 = vector.extract_strided_slice %26 {offsets = [0, 0], sizes = [8, 1], strides = [1, 1]} : vector<8x4xf32> to vector<8x1xf32>
    %31 = vector.extract_strided_slice %29 {offsets = [0, 0], sizes = [1, 256], strides = [1, 1]} : vector<4x256xf32> to vector<1x256xf32>
    %32 = vector.broadcast %30 : vector<8x1xf32> to vector<8x256xf32>
    %33 = vector.broadcast %31 : vector<1x256xf32> to vector<8x256xf32>
    %34 = arith.mulf %32, %33 : vector<8x256xf32>
    %35 = vector.extract_strided_slice %26 {offsets = [0, 1], sizes = [8, 1], strides = [1, 1]} : vector<8x4xf32> to vector<8x1xf32>
    %36 = vector.extract_strided_slice %29 {offsets = [1, 0], sizes = [1, 256], strides = [1, 1]} : vector<4x256xf32> to vector<1x256xf32>
    %37 = vector.broadcast %35 : vector<8x1xf32> to vector<8x256xf32>
    %38 = vector.broadcast %36 : vector<1x256xf32> to vector<8x256xf32>
    %39 = arith.mulf %37, %38 : vector<8x256xf32>
    %40 = arith.addf %34, %39 : vector<8x256xf32>
    %41 = vector.extract_strided_slice %26 {offsets = [0, 2], sizes = [8, 1], strides = [1, 1]} : vector<8x4xf32> to vector<8x1xf32>
    %42 = vector.extract_strided_slice %29 {offsets = [2, 0], sizes = [1, 256], strides = [1, 1]} : vector<4x256xf32> to vector<1x256xf32>
    %43 = vector.broadcast %41 : vector<8x1xf32> to vector<8x256xf32>
    %44 = vector.broadcast %42 : vector<1x256xf32> to vector<8x256xf32>
    %45 = arith.mulf %43, %44 : vector<8x256xf32>
    %46 = arith.addf %40, %45 : vector<8x256xf32>
    %47 = vector.extract_strided_slice %26 {offsets = [0, 3], sizes = [8, 1], strides = [1, 1]} : vector<8x4xf32> to vector<8x1xf32>
    %48 = vector.extract_strided_slice %29 {offsets = [3, 0], sizes = [1, 256], strides = [1, 1]} : vector<4x256xf32> to vector<1x256xf32>
    %49 = vector.broadcast %47 : vector<8x1xf32> to vector<8x256xf32>
    %50 = vector.broadcast %48 : vector<1x256xf32> to vector<8x256xf32>
    %51 = arith.mulf %49, %50 : vector<8x256xf32>
    %52 = arith.addf %46, %51 : vector<8x256xf32>
    %cst = arith.constant dense<0.000000e+00> : vector<8xf32>
    %53 = vector.multi_reduction <add>, %52, %cst [1] : vector<8x256xf32> to vector<8xf32>
    %54 = vector.shape_cast %53 : vector<8xf32> to vector<8x1xf32>
    %55 = arith.mulf %52, %52 : vector<8x256xf32>
    %cst_13 = arith.constant dense<0.000000e+00> : vector<8xf32>
    %56 = vector.multi_reduction <add>, %55, %cst_13 [1] : vector<8x256xf32> to vector<8xf32>
    %57 = vector.shape_cast %56 : vector<8xf32> to vector<8x1xf32>
    %58 = vector.shape_cast %54 : vector<8x1xf32> to vector<1x8x1xf32>
    %cst_14 = arith.constant dense<0.000000e+00> : vector<1xf32>
    %59 = vector.multi_reduction <add>, %58, %cst_14 [1, 2] : vector<1x8x1xf32> to vector<1xf32>
    %60 = vector.shape_cast %59 : vector<1xf32> to vector<1x1x1xf32>
    %61 = vector.extract %60[0, 0, 0] : f32 from vector<1x1x1xf32>
    %cst_15 = arith.constant 4.8828125E-4 : f32
    %62 = arith.mulf %61, %cst_15 : f32
    %63 = vector.shape_cast %57 : vector<8x1xf32> to vector<1x8x1xf32>
    %cst_16 = arith.constant dense<0.000000e+00> : vector<1xf32>
    %64 = vector.multi_reduction <add>, %63, %cst_16 [1, 2] : vector<1x8x1xf32> to vector<1xf32>
    %65 = vector.shape_cast %64 : vector<1xf32> to vector<1x1x1xf32>
    %66 = vector.extract %65[0, 0, 0] : f32 from vector<1x1x1xf32>
    %cst_17 = arith.constant 4.8828125E-4 : f32
    %67 = arith.mulf %66, %cst_17 : f32
    %68 = arith.mulf %62, %62 : f32
    %69 = arith.subf %67, %68 : f32
    %cst_18 = arith.constant 0.000000e+00 : f32
    %70 = arith.maximumf %69, %cst_18 : f32
    %cst_19 = arith.constant 9.99999974E-6 : f32
    %71 = arith.addf %70, %cst_19 : f32
    %72 = math.rsqrt %71 : f32
    %73 = vector.broadcast %72 : f32 to vector<8x1xf32>
    %74 = arith.mulf %20, %73 : vector<8x1xf32>
    %75 = vector.broadcast %62 : f32 to vector<8x1xf32>
    %76 = arith.mulf %75, %74 : vector<8x1xf32>
    %77 = arith.subf %21, %76 : vector<8x1xf32>
    %78 = vector.broadcast %74 : vector<8x1xf32> to vector<8x256xf32>
    %79 = arith.mulf %52, %78 : vector<8x256xf32>
    %80 = vector.broadcast %77 : vector<8x1xf32> to vector<8x256xf32>
    %81 = arith.addf %79, %80 : vector<8x256xf32>
    %cst_20 = arith.constant 0.000000e+00 : f32
    %82 = vector.broadcast %cst_20 : f32 to vector<8x256xf32>
    %83 = arith.cmpf ogt, %81, %82 : vector<8x256xf32>
    %cst_21 = arith.constant 2.000000e-01 : f32
    %84 = vector.broadcast %cst_21 : f32 to vector<8x256xf32>
    %85 = arith.mulf %84, %81 : vector<8x256xf32>
    %86 = arith.select %83, %81, %85 : vector<8x256xi1>, vector<8x256xf32>
    %c1_i32_22 = arith.constant 1 : i32
    %87 = tpu.dynamic_rotate %86 by %c1_i32_22 dim 1 : vector<8x256xf32>, i32 -> vector<8x256xf32>
    %c255_i32 = arith.constant 255 : i32
    %88 = tpu.dynamic_rotate %86 by %c255_i32 dim 1 : vector<8x256xf32>, i32 -> vector<8x256xf32>
    %89 = vector.shape_cast %4 : vector<1x256xi1> to vector<1x256xi1>
    %90 = vector.broadcast %89 : vector<1x256xi1> to vector<8x256xi1>
    %91 = arith.select %90, %88, %87 : vector<8x256xi1>, vector<8x256xf32>
    %c16_i32 = arith.constant 16 : i32
    %92 = tpu.dynamic_rotate %91 by %c16_i32 dim 1 : vector<8x256xf32>, i32 -> vector<8x256xf32>
    %c240_i32 = arith.constant 240 : i32
    %93 = tpu.dynamic_rotate %91 by %c240_i32 dim 1 : vector<8x256xf32>, i32 -> vector<8x256xf32>
    %94 = vector.shape_cast %12 : vector<1x256xi1> to vector<1x256xi1>
    %95 = vector.broadcast %94 : vector<1x256xi1> to vector<8x256xi1>
    %96 = arith.select %95, %93, %92 : vector<8x256xi1>, vector<8x256xf32>
    %97 = vector.shape_cast %16 : vector<1x256xi1> to vector<1x256xi1>
    %98 = vector.broadcast %97 : vector<1x256xi1> to vector<8x256xi1>
    %99 = arith.select %98, %92, %93 : vector<8x256xi1>, vector<8x256xf32>
    %100 = vector.extract_strided_slice %18 {offsets = [0, 0], sizes = [8, 1], strides = [1, 1]} : vector<8x9xf32> to vector<8x1xf32>
    %101 = vector.broadcast %100 : vector<8x1xf32> to vector<8x256xf32>
    %102 = arith.mulf %96, %101 : vector<8x256xf32>
    %103 = vector.extract_strided_slice %18 {offsets = [0, 3], sizes = [8, 1], strides = [1, 1]} : vector<8x9xf32> to vector<8x1xf32>
    %104 = vector.broadcast %103 : vector<8x1xf32> to vector<8x256xf32>
    %105 = arith.mulf %91, %104 : vector<8x256xf32>
    %106 = arith.addf %102, %105 : vector<8x256xf32>
    %107 = vector.extract_strided_slice %18 {offsets = [0, 6], sizes = [8, 1], strides = [1, 1]} : vector<8x9xf32> to vector<8x1xf32>
    %108 = vector.broadcast %107 : vector<8x1xf32> to vector<8x256xf32>
    %109 = arith.mulf %99, %108 : vector<8x256xf32>
    %110 = arith.addf %106, %109 : vector<8x256xf32>
    %c16_i32_23 = arith.constant 16 : i32
    %111 = tpu.dynamic_rotate %86 by %c16_i32_23 dim 1 : vector<8x256xf32>, i32 -> vector<8x256xf32>
    %c240_i32_24 = arith.constant 240 : i32
    %112 = tpu.dynamic_rotate %86 by %c240_i32_24 dim 1 : vector<8x256xf32>, i32 -> vector<8x256xf32>
    %113 = vector.shape_cast %12 : vector<1x256xi1> to vector<1x256xi1>
    %114 = vector.broadcast %113 : vector<1x256xi1> to vector<8x256xi1>
    %115 = arith.select %114, %112, %111 : vector<8x256xi1>, vector<8x256xf32>
    %116 = vector.shape_cast %16 : vector<1x256xi1> to vector<1x256xi1>
    %117 = vector.broadcast %116 : vector<1x256xi1> to vector<8x256xi1>
    %118 = arith.select %117, %111, %112 : vector<8x256xi1>, vector<8x256xf32>
    %119 = vector.extract_strided_slice %18 {offsets = [0, 1], sizes = [8, 1], strides = [1, 1]} : vector<8x9xf32> to vector<8x1xf32>
    %120 = vector.broadcast %119 : vector<8x1xf32> to vector<8x256xf32>
    %121 = arith.mulf %115, %120 : vector<8x256xf32>
    %122 = vector.extract_strided_slice %18 {offsets = [0, 4], sizes = [8, 1], strides = [1, 1]} : vector<8x9xf32> to vector<8x1xf32>
    %123 = vector.broadcast %122 : vector<8x1xf32> to vector<8x256xf32>
    %124 = arith.mulf %86, %123 : vector<8x256xf32>
    %125 = arith.addf %121, %124 : vector<8x256xf32>
    %126 = vector.extract_strided_slice %18 {offsets = [0, 7], sizes = [8, 1], strides = [1, 1]} : vector<8x9xf32> to vector<8x1xf32>
    %127 = vector.broadcast %126 : vector<8x1xf32> to vector<8x256xf32>
    %128 = arith.mulf %118, %127 : vector<8x256xf32>
    %129 = arith.addf %125, %128 : vector<8x256xf32>
    %c255_i32_25 = arith.constant 255 : i32
    %130 = tpu.dynamic_rotate %86 by %c255_i32_25 dim 1 : vector<8x256xf32>, i32 -> vector<8x256xf32>
    %c1_i32_26 = arith.constant 1 : i32
    %131 = tpu.dynamic_rotate %86 by %c1_i32_26 dim 1 : vector<8x256xf32>, i32 -> vector<8x256xf32>
    %132 = vector.shape_cast %8 : vector<1x256xi1> to vector<1x256xi1>
    %133 = vector.broadcast %132 : vector<1x256xi1> to vector<8x256xi1>
    %134 = arith.select %133, %131, %130 : vector<8x256xi1>, vector<8x256xf32>
    %c16_i32_27 = arith.constant 16 : i32
    %135 = tpu.dynamic_rotate %134 by %c16_i32_27 dim 1 : vector<8x256xf32>, i32 -> vector<8x256xf32>
    %c240_i32_28 = arith.constant 240 : i32
    %136 = tpu.dynamic_rotate %134 by %c240_i32_28 dim 1 : vector<8x256xf32>, i32 -> vector<8x256xf32>
    %137 = vector.shape_cast %12 : vector<1x256xi1> to vector<1x256xi1>
    %138 = vector.broadcast %137 : vector<1x256xi1> to vector<8x256xi1>
    %139 = arith.select %138, %136, %135 : vector<8x256xi1>, vector<8x256xf32>
    %140 = vector.shape_cast %16 : vector<1x256xi1> to vector<1x256xi1>
    %141 = vector.broadcast %140 : vector<1x256xi1> to vector<8x256xi1>
    %142 = arith.select %141, %135, %136 : vector<8x256xi1>, vector<8x256xf32>
    %143 = vector.extract_strided_slice %18 {offsets = [0, 2], sizes = [8, 1], strides = [1, 1]} : vector<8x9xf32> to vector<8x1xf32>
    %144 = vector.broadcast %143 : vector<8x1xf32> to vector<8x256xf32>
    %145 = arith.mulf %139, %144 : vector<8x256xf32>
    %146 = vector.extract_strided_slice %18 {offsets = [0, 5], sizes = [8, 1], strides = [1, 1]} : vector<8x9xf32> to vector<8x1xf32>
    %147 = vector.broadcast %146 : vector<8x1xf32> to vector<8x256xf32>
    %148 = arith.mulf %134, %147 : vector<8x256xf32>
    %149 = arith.addf %145, %148 : vector<8x256xf32>
    %150 = vector.extract_strided_slice %18 {offsets = [0, 8], sizes = [8, 1], strides = [1, 1]} : vector<8x9xf32> to vector<8x1xf32>
    %151 = vector.broadcast %150 : vector<8x1xf32> to vector<8x256xf32>
    %152 = arith.mulf %142, %151 : vector<8x256xf32>
    %153 = arith.addf %149, %152 : vector<8x256xf32>
    %154 = arith.addf %110, %153 : vector<8x256xf32>
    %155 = vector.broadcast %19 : vector<8x1xf32> to vector<8x256xf32>
    %156 = arith.addf %129, %155 : vector<8x256xf32>
    %157 = arith.addf %154, %156 : vector<8x256xf32>
    %cst_29 = arith.constant dense<0.000000e+00> : vector<8xf32>
    %158 = vector.multi_reduction <add>, %157, %cst_29 [1] : vector<8x256xf32> to vector<8xf32>
    %159 = vector.shape_cast %158 : vector<8xf32> to vector<8x1xf32>
    %160 = arith.mulf %157, %157 : vector<8x256xf32>
    %cst_30 = arith.constant dense<0.000000e+00> : vector<8xf32>
    %161 = vector.multi_reduction <add>, %160, %cst_30 [1] : vector<8x256xf32> to vector<8xf32>
    %162 = vector.shape_cast %161 : vector<8xf32> to vector<8x1xf32>
    %163 = vector.shape_cast %159 : vector<8x1xf32> to vector<1x8x1xf32>
    %cst_31 = arith.constant dense<0.000000e+00> : vector<1xf32>
    %164 = vector.multi_reduction <add>, %163, %cst_31 [1, 2] : vector<1x8x1xf32> to vector<1xf32>
    %165 = vector.shape_cast %164 : vector<1xf32> to vector<1x1x1xf32>
    %166 = vector.extract %165[0, 0, 0] : f32 from vector<1x1x1xf32>
    %cst_32 = arith.constant 4.8828125E-4 : f32
    %167 = arith.mulf %166, %cst_32 : f32
    %168 = vector.shape_cast %162 : vector<8x1xf32> to vector<1x8x1xf32>
    %cst_33 = arith.constant dense<0.000000e+00> : vector<1xf32>
    %169 = vector.multi_reduction <add>, %168, %cst_33 [1, 2] : vector<1x8x1xf32> to vector<1xf32>
    %170 = vector.shape_cast %169 : vector<1xf32> to vector<1x1x1xf32>
    %171 = vector.extract %170[0, 0, 0] : f32 from vector<1x1x1xf32>
    %cst_34 = arith.constant 4.8828125E-4 : f32
    %172 = arith.mulf %171, %cst_34 : f32
    %173 = arith.mulf %167, %167 : f32
    %174 = arith.subf %172, %173 : f32
    %cst_35 = arith.constant 0.000000e+00 : f32
    %175 = arith.maximumf %174, %cst_35 : f32
    %cst_36 = arith.constant 9.99999974E-6 : f32
    %176 = arith.addf %175, %cst_36 : f32
    %177 = math.rsqrt %176 : f32
    %178 = vector.broadcast %177 : f32 to vector<8x1xf32>
    %179 = arith.mulf %22, %178 : vector<8x1xf32>
    %180 = vector.broadcast %167 : f32 to vector<8x1xf32>
    %181 = arith.mulf %180, %179 : vector<8x1xf32>
    %182 = arith.subf %23, %181 : vector<8x1xf32>
    %183 = vector.broadcast %179 : vector<8x1xf32> to vector<8x256xf32>
    %184 = arith.mulf %157, %183 : vector<8x256xf32>
    %185 = vector.broadcast %182 : vector<8x1xf32> to vector<8x256xf32>
    %186 = arith.addf %184, %185 : vector<8x256xf32>
    %cst_37 = arith.constant 0.000000e+00 : f32
    %187 = vector.broadcast %cst_37 : f32 to vector<8x256xf32>
    %188 = arith.cmpf ogt, %186, %187 : vector<8x256xf32>
    %cst_38 = arith.constant 2.000000e-01 : f32
    %189 = vector.broadcast %cst_38 : f32 to vector<8x256xf32>
    %190 = arith.mulf %189, %186 : vector<8x256xf32>
    %191 = arith.select %188, %186, %190 : vector<8x256xi1>, vector<8x256xf32>
    %192 = vector.extract_strided_slice %27 {offsets = [0, 0], sizes = [4, 1], strides = [1, 1]} : vector<4x8xf32> to vector<4x1xf32>
    %193 = vector.extract_strided_slice %191 {offsets = [0, 0], sizes = [1, 256], strides = [1, 1]} : vector<8x256xf32> to vector<1x256xf32>
    %194 = vector.broadcast %192 : vector<4x1xf32> to vector<4x256xf32>
    %195 = vector.broadcast %193 : vector<1x256xf32> to vector<4x256xf32>
    %196 = arith.mulf %194, %195 : vector<4x256xf32>
    %197 = vector.extract_strided_slice %27 {offsets = [0, 1], sizes = [4, 1], strides = [1, 1]} : vector<4x8xf32> to vector<4x1xf32>
    %198 = vector.extract_strided_slice %191 {offsets = [1, 0], sizes = [1, 256], strides = [1, 1]} : vector<8x256xf32> to vector<1x256xf32>
    %199 = vector.broadcast %197 : vector<4x1xf32> to vector<4x256xf32>
    %200 = vector.broadcast %198 : vector<1x256xf32> to vector<4x256xf32>
    %201 = arith.mulf %199, %200 : vector<4x256xf32>
    %202 = arith.addf %196, %201 : vector<4x256xf32>
    %203 = vector.extract_strided_slice %27 {offsets = [0, 2], sizes = [4, 1], strides = [1, 1]} : vector<4x8xf32> to vector<4x1xf32>
    %204 = vector.extract_strided_slice %191 {offsets = [2, 0], sizes = [1, 256], strides = [1, 1]} : vector<8x256xf32> to vector<1x256xf32>
    %205 = vector.broadcast %203 : vector<4x1xf32> to vector<4x256xf32>
    %206 = vector.broadcast %204 : vector<1x256xf32> to vector<4x256xf32>
    %207 = arith.mulf %205, %206 : vector<4x256xf32>
    %208 = arith.addf %202, %207 : vector<4x256xf32>
    %209 = vector.extract_strided_slice %27 {offsets = [0, 3], sizes = [4, 1], strides = [1, 1]} : vector<4x8xf32> to vector<4x1xf32>
    %210 = vector.extract_strided_slice %191 {offsets = [3, 0], sizes = [1, 256], strides = [1, 1]} : vector<8x256xf32> to vector<1x256xf32>
    %211 = vector.broadcast %209 : vector<4x1xf32> to vector<4x256xf32>
    %212 = vector.broadcast %210 : vector<1x256xf32> to vector<4x256xf32>
    %213 = arith.mulf %211, %212 : vector<4x256xf32>
    %214 = arith.addf %208, %213 : vector<4x256xf32>
    %215 = vector.extract_strided_slice %27 {offsets = [0, 4], sizes = [4, 1], strides = [1, 1]} : vector<4x8xf32> to vector<4x1xf32>
    %216 = vector.extract_strided_slice %191 {offsets = [4, 0], sizes = [1, 256], strides = [1, 1]} : vector<8x256xf32> to vector<1x256xf32>
    %217 = vector.broadcast %215 : vector<4x1xf32> to vector<4x256xf32>
    %218 = vector.broadcast %216 : vector<1x256xf32> to vector<4x256xf32>
    %219 = arith.mulf %217, %218 : vector<4x256xf32>
    %220 = arith.addf %214, %219 : vector<4x256xf32>
    %221 = vector.extract_strided_slice %27 {offsets = [0, 5], sizes = [4, 1], strides = [1, 1]} : vector<4x8xf32> to vector<4x1xf32>
    %222 = vector.extract_strided_slice %191 {offsets = [5, 0], sizes = [1, 256], strides = [1, 1]} : vector<8x256xf32> to vector<1x256xf32>
    %223 = vector.broadcast %221 : vector<4x1xf32> to vector<4x256xf32>
    %224 = vector.broadcast %222 : vector<1x256xf32> to vector<4x256xf32>
    %225 = arith.mulf %223, %224 : vector<4x256xf32>
    %226 = arith.addf %220, %225 : vector<4x256xf32>
    %227 = vector.extract_strided_slice %27 {offsets = [0, 6], sizes = [4, 1], strides = [1, 1]} : vector<4x8xf32> to vector<4x1xf32>
    %228 = vector.extract_strided_slice %191 {offsets = [6, 0], sizes = [1, 256], strides = [1, 1]} : vector<8x256xf32> to vector<1x256xf32>
    %229 = vector.broadcast %227 : vector<4x1xf32> to vector<4x256xf32>
    %230 = vector.broadcast %228 : vector<1x256xf32> to vector<4x256xf32>
    %231 = arith.mulf %229, %230 : vector<4x256xf32>
    %232 = arith.addf %226, %231 : vector<4x256xf32>
    %233 = vector.extract_strided_slice %27 {offsets = [0, 7], sizes = [4, 1], strides = [1, 1]} : vector<4x8xf32> to vector<4x1xf32>
    %234 = vector.extract_strided_slice %191 {offsets = [7, 0], sizes = [1, 256], strides = [1, 1]} : vector<8x256xf32> to vector<1x256xf32>
    %235 = vector.broadcast %233 : vector<4x1xf32> to vector<4x256xf32>
    %236 = vector.broadcast %234 : vector<1x256xf32> to vector<4x256xf32>
    %237 = arith.mulf %235, %236 : vector<4x256xf32>
    %238 = arith.addf %232, %237 : vector<4x256xf32>
    %cst_39 = arith.constant dense<0.000000e+00> : vector<4xf32>
    %239 = vector.multi_reduction <add>, %238, %cst_39 [1] : vector<4x256xf32> to vector<4xf32>
    %240 = vector.shape_cast %239 : vector<4xf32> to vector<4x1xf32>
    %241 = arith.mulf %238, %238 : vector<4x256xf32>
    %cst_40 = arith.constant dense<0.000000e+00> : vector<4xf32>
    %242 = vector.multi_reduction <add>, %241, %cst_40 [1] : vector<4x256xf32> to vector<4xf32>
    %243 = vector.shape_cast %242 : vector<4xf32> to vector<4x1xf32>
    %244 = vector.shape_cast %240 : vector<4x1xf32> to vector<1x4x1xf32>
    %cst_41 = arith.constant dense<0.000000e+00> : vector<1xf32>
    %245 = vector.multi_reduction <add>, %244, %cst_41 [1, 2] : vector<1x4x1xf32> to vector<1xf32>
    %246 = vector.shape_cast %245 : vector<1xf32> to vector<1x1x1xf32>
    %247 = vector.extract %246[0, 0, 0] : f32 from vector<1x1x1xf32>
    %cst_42 = arith.constant 9.765625E-4 : f32
    %248 = arith.mulf %247, %cst_42 : f32
    %249 = vector.shape_cast %243 : vector<4x1xf32> to vector<1x4x1xf32>
    %cst_43 = arith.constant dense<0.000000e+00> : vector<1xf32>
    %250 = vector.multi_reduction <add>, %249, %cst_43 [1, 2] : vector<1x4x1xf32> to vector<1xf32>
    %251 = vector.shape_cast %250 : vector<1xf32> to vector<1x1x1xf32>
    %252 = vector.extract %251[0, 0, 0] : f32 from vector<1x1x1xf32>
    %cst_44 = arith.constant 9.765625E-4 : f32
    %253 = arith.mulf %252, %cst_44 : f32
    %254 = arith.mulf %248, %248 : f32
    %255 = arith.subf %253, %254 : f32
    %cst_45 = arith.constant 0.000000e+00 : f32
    %256 = arith.maximumf %255, %cst_45 : f32
    %cst_46 = arith.constant 9.99999974E-6 : f32
    %257 = arith.addf %256, %cst_46 : f32
    %258 = math.rsqrt %257 : f32
    %259 = vector.broadcast %258 : f32 to vector<4x1xf32>
    %260 = arith.mulf %24, %259 : vector<4x1xf32>
    %261 = vector.broadcast %248 : f32 to vector<4x1xf32>
    %262 = arith.mulf %261, %260 : vector<4x1xf32>
    %263 = arith.subf %25, %262 : vector<4x1xf32>
    %264 = vector.broadcast %260 : vector<4x1xf32> to vector<4x256xf32>
    %265 = arith.mulf %238, %264 : vector<4x256xf32>
    %266 = vector.broadcast %263 : vector<4x1xf32> to vector<4x256xf32>
    %267 = arith.addf %265, %266 : vector<4x256xf32>
    %268 = arith.addf %267, %29 : vector<4x256xf32>
    %c0_47 = arith.constant 0 : index
    %c0_48 = arith.constant 0 : index
    %c0_49 = arith.constant 0 : index
    %269 = vector.load %arg6[%c0_47, %c0_48, %c0_49] : memref<1x4x256xf32, #tpu.memory_space<vmem>>, vector<1x4x256xf32>
    %270 = vector.shape_cast %269 : vector<1x4x256xf32> to vector<4x256xf32>
    %271 = vector.shape_cast %268 : vector<4x256xf32> to vector<1x4x256xf32>
    tpu.vector_store %arg6[%c0_47, %c0_48, %c0_49], %271 {strides = array<i32>} : memref<1x4x256xf32, #tpu.memory_space<vmem>>, vector<1x4x256xf32>,
    return
  }
  func.func @transform_0(%arg0: i32) -> (i32, i32, i32) {
    %c0_i32 = arith.constant 0 : i32
    %c0_i32_0 = arith.constant 0 : i32
    %c0_i32_1 = arith.constant 0 : i32
    return %arg0, %c0_i32, %c0_i32_0 : i32, i32, i32
  }
  func.func @transform_1(%arg0: i32) -> (i32, i32) {
    %c0_i32 = arith.constant 0 : i32
    %c0_i32_0 = arith.constant 0 : i32
    %c0_i32_1 = arith.constant 0 : i32
    return %c0_i32, %c0_i32_0 : i32, i32
  }
  func.func @transform_2(%arg0: i32) -> (i32, i32) {
    %c0_i32 = arith.constant 0 : i32
    %c0_i32_0 = arith.constant 0 : i32
    %c0_i32_1 = arith.constant 0 : i32
    return %c0_i32, %c0_i32_0 : i32, i32
  }
  func.func @transform_3(%arg0: i32) -> (i32, i32) {
    %c0_i32 = arith.constant 0 : i32
    %c0_i32_0 = arith.constant 0 : i32
    %c0_i32_1 = arith.constant 0 : i32
    return %c0_i32, %c0_i32_0 : i32, i32
  }
  func.func @transform_4(%arg0: i32) -> (i32, i32) {
    %c0_i32 = arith.constant 0 : i32
    %c0_i32_0 = arith.constant 0 : i32
    %c0_i32_1 = arith.constant 0 : i32
    return %c0_i32, %c0_i32_0 : i32, i32
  }
  func.func @transform_5(%arg0: i32) -> (i32, i32, i32) {
    %c0_i32 = arith.constant 0 : i32
    %c0_i32_0 = arith.constant 0 : i32
    %c0_i32_1 = arith.constant 0 : i32
    return %arg0, %c0_i32, %c0_i32_0 : i32, i32, i32
  }
}

</mosaic_0001>

<bundles_post_ra>
// kernel: tpu_custom_call.1
= control target key start
LH: loop header
LB: loop body
LE: loop exit
PB: predicated region body
PF: predicated region fallthrough
CT: control target
= control target key end

     0   :  { %10 = vsyncpa [#allocation3], 0  ;;  %s1711_s0 = inlined_call_operand.hbm [shape: f32[2,4,256], index: 0, kind: input, shape index: {}]   ;;  %s1712_s1 = inlined_call_operand.vmem [shape: s32[1,256], index: 1, kind: input, shape index: {}]   ;;  %s1713_s2 = inlined_call_operand.vmem [shape: f32[8,4], index: 2, kind: input, shape index: {}]   ;;  %s1714_s3 = inlined_call_operand.vmem [shape: f32[4,8], index: 3, kind: input, shape index: {}]   ;;  %s1715_s4 = inlined_call_operand.vmem [shape: f32[8,16], index: 4, kind: input, shape index: {}]   ;;  %s1716_s5 = inlined_call_operand.hbm [shape: f32[2,4,256], index: 5, kind: output, shape index: {}]  }
   0x1   :  { %12 = vsyncpa [#allocation3 + $0x1], 0 }
   0x2   :  { %13 = vsyncpa [#allocation4], 0 }
   0x3   :  { %15 = vsyncpa [#allocation4 + $0x1], 0  ;;  %s1257_s18 = smov 0   ;;  %s1259_s19 = smov 0  }
   0x4   :  { %s1261_s20 = smov 0   ;;  %s1263_s21 = smov 0  }
   0x5 LB: > { %s1278_s22 = sadd.s32 4294967295, %s1202_s21   ;;  %s969_s23 = sadd.s32 4294967294, %s1202_s21   ;;  %s1202_s21 = sphi %s1263_s21, %s1739_s21   ;;  %s1198_s20 = sphi %s1261_s20, %s1738_s20   ;;  %s1194_s19 = sphi %s1259_s19, %s1737_s19   ;;  %s1190_s18 = sphi %s1257_s18, %s1736_s18  }
   0x6   : > { %s1282_s24 = sadd.s32 1, %s1202_s21   ;;  %s28_s25 = sadd.s32 1, %s1198_s20 }
   0x7   : > { %s25_s26 = ssub.s32 %s1202_s21, %s1282_s24  ;;  %p35_p0 = scmp.ne.s32.totalorder %s1198_s20, %s1194_s19 }
   0x8   : > { %p26_p1 = scmp.eq.s32.totalorder %s25_s26, 0  ;;  %p36_p2 = scmp.eq.s32.totalorder %s1202_s21, 0 }
   0x9   : > { %p41_p3 = scmp.ne.s32.totalorder %s1194_s19, %s1190_s18  ;;  %p42_p4 = scmp.eq.s32.totalorder %s1278_s22, 0 }
   0xa   : > { %s1294_s27 = scalar_select %p26_p1, %s1198_s20, %s28_s25  }
   0xb   : > { %p1296_p5 = por %p36_p2, %p35_p0  ;;  %p1300_p6 = por %p42_p4, %p41_p3 }
   0xc   : > { %p149_p7 = scmp.eq.s32.totalorder %s1278_s22, 1  ;;  %p155_p8 = scmp.eq.s32.totalorder %s969_s23, 1 }
   0xd   : > { %p1015_p10 = scmp.lt.s32.totalorder %s1202_s21, 2  ;;  %s187_s7 = sand.u32 1, %s1198_s20  }
   0xe   : > { %p1307_p11 = por %p149_p7, %p35_p0  ;;  %p1311_p12 = por %p155_p8, %p41_p3 }
   0xf   : > { %s983_s8 = sshll.u32 %s1202_s21, 7  ;;  %s972_s9 = sshll.u32 %s187_s7, 3 }
  0x10   : > { %s1720_s30 = scalar_select %p1307_p11, 1, 0 }
  0x11   : > { %s1721_s6 = scalar_select %p1311_p12, 1, 0 }
  0x12   : > { %s1320_s12 = scalar_lea.hbm %s1711_s0, %s983_s8  ;;  %s191_s13 = scalar_lea.vmem [#allocation2], %s972_s9 }
  0x13   : > { %s199_s14 = sshll.u32 %s191_s13, 4  ;;  %p1324_p13 = pnand %p1015_p10, %p1296_p5  ;;  %s1328_s14 = int_to_ptr.vmem [resolvable:$true] %s199_s14 }
  0x14   : > { %s188_s16 = scalar_lea.sflag [#allocation3], %s187_s7  ;;  %s1106_s17 = scalar_lea.hbm %s1320_s12, 128 }
  0x15   : > { %p1107_p2 = scmp.ne.s32.totalorder %s1320_s12, %s1106_s17  ;;  %p1108_p3 = pneg %p1324_p13 }
  0x16   : > { %s1111_s26 = scalar_lea.hbm %s1711_s0, 256  ;;  %p1112_p5 = scmp.lt.u32.totalorder %s1320_s12, %s1711_s0 }
  0x17   : > { %p1109_p4 = pnand %p1108_p3, %p1107_p2  ;;  %p1113_p8 = scmp.lt.u32.totalorder %s1111_s26, %s1106_s17 }
  0x18   : > { %p1115_p9 = scmp.lt.u32.totalorder %s1106_s17, %s1320_s12 }
  0x19   : > { %p1110_p7 = pneg %p1109_p4  ;;  %p1114_p10 = por %p1113_p8, %p1112_p5 }
  0x1b   : > { %p1116_p0 = por %p1115_p9, %p1114_p10 }
  0x1d   : > { %p1117_p1 = pnand %p1116_p0, %p1110_p7 }
  0x1f   : > { %1120 = shalt.err (!%p1117_p1)
}
  0x20   : > { %s1121_s7 = scalar_lea.vmem %s1328_s14, 128  ;;  %s1204_s9 = smov [#allocation2]  }
  0x21   : > { %p1122_p2 = scmp.ne.s32.totalorder %s1328_s14, %s1121_s7  ;;  %s1126_s10 = sshll.u32 %s1204_s9, 4  ;;  %s1127_s10 = int_to_ptr.vmem [resolvable:$false] %s1126_s10 }
  0x22   : > { %s1128_s11 = scalar_lea.vmem %s1127_s10, 256  ;;  %p1129_p11 = scmp.lt.s32.totalorder %s1328_s14, %s1127_s10 }
  0x23   : > { %p1124_p4 = pnand %p1122_p2, %p1108_p3  ;;  %p1130_p5 = scmp.lt.s32.totalorder %s1128_s11, %s1121_s7 }
  0x25   : > { %p1125_p12 = pneg %p1124_p4  ;;  %p1131_p8 = por %p1130_p5, %p1129_p11 }
  0x27   : > { %p1132_p9 = pnand %p1131_p8, %p1125_p12 }
  0x29   : > { %1135 = shalt.err (!%p1132_p9)
}
  0x2a   : > { %1010 = dma.hbm_to_vmem [thread:$0]  (!%p1324_p13), %s1320_s12, 128, %s1328_s14, %s188_s16  }
  0x2b   : > { %p1723_p0 = scmp.lt.s32.totalorder %s1202_s21, 3  ;;  %p1724_p1 = scmp.ge.s32.totalorder %s1202_s21, 1 }
  0x2d   : > { %p205_p3 = pnand %p1724_p1, %p1723_p0 }
  0x2e   : > { %s1362_s13 = sand.u32 (!%p205_p3), 1, %s1194_s19  }
  0x2f   : > { %208 = sbr.rel (%p205_p3) target bundleno = 2537 (0x9e9), region = 40  ;;  %s976_s17 = sshll.u32 (!%p205_p3), %s1362_s13, 3 }
  0x30   : > { %s211_s23 = scalar_lea.sflag (!%p205_p3), [#allocation3], %s1362_s13  ;;  %s214_s15 = scalar_lea.vmem (!%p205_p3), [#allocation2], %s976_s17 }
  0x36   : > { %1181 = dma.done.wait (%p1300_p6), %s211_s23, 128  }
  0x37   : > { %1183 = vsyncadd (%p1300_p6), %s211_s23, 4294967168  ;;  %v1205_v0 = vmov 0   ;;  %v1206_v1 = vmov 2   ;;  %v251_v2 = vld [vmem:[%s1713_s2] sm:$0xff]  ;;  %v1207_v3 = vmov 1   ;;  %v1208_v4 = vmov 3  }
  0x38   : > { %1070 = vset.pattern.permute.xlu0 %v1205_v0  ;;  %1072 = vset.pattern.permute.xlu1 %v1206_v1  ;;  %v260_v5 = vlaneseq  ;;  %v1389_v11 = vld [vmem:[%s214_s15] sm:$0xff]  ;;  %vm366_vm0 = vcmask 7168   ;;  %s1210_s7 = smov 0.0   ;;  %s1211_s12 = smov 1  }
  0x39   : > { %256 = vperm.xlu0 %1070, %v251_v2   ;;  %307 = vperm.xlu1 %1072, %v251_v2   ;;  %s1213_s14 = smov 127   ;;  %p1733_p11 = scmp.ne.s32.totalorder %s1720_s30, 0 }
  0x3a   : > { %v261_v6 = vshrl.u32 %v260_v5, 7 }
  0x3c   : > { %v1381_v7 = vsub.s32 0, %v261_v6  ;;  %v1383_v8 = vsub.s32 4, %v261_v6  ;;  %v1385_v9 = vsub.s32 1, %v261_v6  ;;  %v1387_v10 = vsub.s32 5, %v261_v6 }
  0x3d   : > { %1071 = vset.pattern.permute.xlu0 %v1207_v3  ;;  %1073 = vset.pattern.permute.xlu1 %v1208_v4  ;;  %v1391_v12 = vsub.s32 2, %v261_v6  ;;  %v1393_v13 = vsub.s32 6, %v261_v6  ;;  %v1395_v14 = vsub.s32 3, %v261_v6  ;;  %v1397_v15 = vsub.s32 7, %v261_v6 }
  0x3e   : > { %281 = vperm.xlu0 %1071, %v251_v2   ;;  %333 = vperm.xlu1 %1073, %v251_v2   ;;  %v263_v16 = vrot.slane %v1389_v11, %v1381_v7  ;;  %v267_v17 = vrot.slane %v1389_v11, %v1383_v8  ;;  %v287_v18 = vrot.slane %v1389_v11, %v1385_v9 }
  0x3f   : > { %v291_v19 = vrot.slane %v1389_v11, %v1387_v10  ;;  %v313_v20 = vrot.slane %v1389_v11, %v1391_v12  ;;  %v317_v21 = vrot.slane %v1389_v11, %v1393_v13  ;;  %v339_v24 = vrot.slane %v1389_v11, %v1395_v14 }
  0x40   : > { %v343_v25 = vrot.slane %v1389_v11, %v1397_v15  ;;  %v273_v26 = vrot.slane %v263_v16, %v1381_v7  ;;  %v277_v27 = vrot.slane %v267_v17, %v1381_v7  ;;  %v297_v28 = vrot.slane %v287_v18, %v1385_v9 }
  0x41   : > { %v301_v29 = vrot.slane %v291_v19, %v1385_v9  ;;  %v323_v30 = vrot.slane %v313_v20, %v1391_v12  ;;  %v327_v31 = vrot.slane %v317_v21, %v1391_v12  ;;  %v349_v32 = vrot.slane %v339_v24, %v1395_v14 }
  0x42   : > { %1076 = vset.pattern.permute.xlu0 %v1205_v0  ;;  %v353_v33 = vrot.slane %v343_v25, %v1395_v14  ;;  %v1209_v19 = vmov 10   ;;  %v1429_v25 = vld [vmem:[%s1715_s4] sm:$0xff] }
  0x43   : > { %1074 = vset.pattern.permute.xlu1 %v1209_v19 }
  0xb8   : > { %v257_v22 = vpop.permute.xlu0 %256  ;;  %v308_v23 = vpop.permute.xlu1 %307 }
  0xb9   : > { %v278_v36 = vmul.f32 %v273_v26, %v257_v22  ;;  %v279_v37 = vmul.f32 %v277_v27, %v257_v22  ;;  %v328_v40 = vmul.f32 %v323_v30, %v308_v23  ;;  %v329_v41 = vmul.f32 %v327_v31, %v308_v23 }
  0xba   : > { %v1212_v30 = vmov 11  }
  0xbd   : > { %v282_v34 = vpop.permute.xlu0 %281  ;;  %v334_v35 = vpop.permute.xlu1 %333 }
  0xbe   : > { %v302_v38 = vmul.f32 %v297_v28, %v282_v34  ;;  %v303_v39 = vmul.f32 %v301_v29, %v282_v34  ;;  %v354_v44 = vmul.f32 %v349_v32, %v334_v35  ;;  %v355_v45 = vmul.f32 %v353_v33, %v334_v35 }
  0xc0   : > { %v304_v42 = vadd.f32 %v302_v38, %v278_v36  ;;  %v305_v43 = vadd.f32 %v303_v39, %v279_v37 }
  0xc2   : > { %v330_v46 = vadd.f32 %v328_v40, %v304_v42  ;;  %v331_v47 = vadd.f32 %v329_v41, %v305_v43  ;;  %v1214_v43 = vmov 4  }
  0xc4   : > { %v356_v48 = vadd.f32 %v354_v44, %v330_v46  ;;  %v357_v49 = vadd.f32 %v355_v45, %v331_v47  ;;  %v1215_v44 = vmov 6   ;;  %v1216_v45 = vmov 5  }
  0xc5   : > { %v1218_v46 = vmov 9   ;;  %v1220_v47 = vmov 7  }
  0xc6   : > { %v358_v50 = vadd.f32 %v357_v49, %v356_v48  ;;  %v361_v51 = vmul.f32 %v356_v48, %v356_v48  ;;  %v362_v52 = vmul.f32 %v357_v49, %v357_v49 }
  0xc8   : > { %359 = vadd.xlane.f32.xlu1 %v358_v50  ;;  %v363_v53 = vadd.f32 %v362_v52, %v361_v51 }
  0xca   : > { %364 = vadd.xlane.f32.xlu0 %v363_v53  ;;  %v1474_v53 = vand.u32 127, %v260_v5 }
  0xcc   : > { %vm431_vm5 = vcmp.lt.s32.totalorder %v1474_v53, 1  ;;  %vm438_vm6 = vcmp.lt.s32.totalorder %v1474_v53, 127  ;;  %vm458_vm13 = vcmp.lt.s32.totalorder %v1474_v53, 16  ;;  %vm465_vm14 = vcmp.lt.s32.totalorder %v1474_v53, 112 }
 0x155   : > { %v360_v54 = vpop.xlane.xlu1 %359 }
 0x156   : > { %v367_v55 = vsel %vm366_vm0, %v360_v54, 0.0 }
 0x157   : > { %v365_v56 = vpop.xlane.xlu0 %364  ;;  %368 = vadd.xlane.f32.xlu0 %v367_v55 }
 0x158   : > { %v378_v57 = vsel %vm366_vm0, %v365_v56, 0.0 }
 0x159   : > { %379 = vadd.xlane.f32.xlu1 %v378_v57 }
 0x1e4   : > { %v369_v58 = vpop.xlane.xlu0 %368 }
 0x1e5   : > { %v370_v59 = vrot.slane %v369_v58, 4 }
 0x1e6   : > { %v380_v60 = vpop.xlane.xlu1 %379 }
 0x1e7   : > { %v371_v61 = vadd.f32 %v370_v59, %v369_v58  ;;  %v381_v62 = vrot.slane %v380_v60, 4 }
 0x1e9   : > { %v372_v63 = vrot.slane %v371_v61, 2  ;;  %v382_v2 = vadd.f32 %v381_v62, %v380_v60 }
 0x1eb   : > { %v383_v6 = vrot.slane %v382_v2, 2  ;;  %v373_v16 = vadd.f32 %v372_v63, %v371_v61 }
 0x1ed   : > { %v374_v17 = vrot.slane %v373_v16, 1  ;;  %v384_v18 = vadd.f32 %v383_v6, %v382_v2 }
 0x1ef   : > { %v375_v20 = vadd.f32 %v374_v17, %v373_v16  ;;  %v385_v21 = vrot.slane %v384_v18, 1 }
 0x1f1   : > { %985 = vpush %v375_v20  ;;  %v386_v22 = vadd.f32 %v385_v21, %v384_v18 }
 0x1f3   : > { %987 = vpush %v386_v22 }
 0x222   : > { %s986_s29 = spop %985 }
 0x223   : > { %s377_s16 = smul.f32 0.00048828125, %s986_s29  ;;  %s1217_s29 = smov 16  }
 0x224   : > { %s988_s25 = spop %987 }
 0x225   : > { %s389_s26 = smul.f32 %s377_s16, %s377_s16  ;;  %v398_v28 = vstv %s377_s16  ;;  %s1219_s16 = smov 112  }
 0x226   : > { %s388_s28 = smul.f32 0.00048828125, %s988_s25 }
 0x228   : > { %s390_s8 = ssub.f32 %s388_s28, %s389_s26 }
 0x22a   : > { %s391_s9 = smax.f32 %s1210_s7, %s390_s8 }
 0x22b   : > { %s392_s10 = sadd.f32 1e-05, %s391_s9 }
 0x22d   : > { %v393_v23 = vstv %s392_s10 }
 0x22e   : > { %1100 = vrsqrt.f32 %v393_v23 }
 0x238   : > { %v1101_v24 = vpop.eup %1100 }
 0x239   : > { %989 = vpush %v1101_v24 }
 0x26a   : > { %s990_s15 = spop %989 }
 0x26b   : > { %v396_v26 = vstv %s990_s15 }
 0x26c   : > { %v397_v27 = vmul.f32 %v396_v26, %v1429_v25 }
 0x26e   : > { %v399_v29 = vmul.f32 %v398_v28, %v397_v27  ;;  %407 = vperm.xlu1 %1074, %v397_v27  }
 0x270   : > { %401 = vrot.lane.b32.xlu0 %v399_v29, %s1211_s12 }
 0x272   : > { %1075 = vset.pattern.permute.xlu1 %v1212_v30 }
 0x2e2   : > { %v402_v31 = vpop.permute.xlu0 %401 }
 0x2e3   : > { %v404_v32 = vsub.f32 %v1429_v25, %v402_v31 }
 0x2e5   : > { %414 = vperm.xlu1 %1075, %v404_v32  }
 0x2e9   : > { %1077 = vset.pattern.permute.xlu1 %v1208_v4 }
 0x2ed   : > { %v408_v33 = vpop.permute.xlu1 %407 }
 0x2ee   : > { %v410_v34 = vmul.f32 %v408_v33, %v356_v48  ;;  %v411_v35 = vmul.f32 %v408_v33, %v357_v49  ;;  %v1221_v48 = vmov 8   ;;  %v241_v49 = vld [vmem:[%s1712_s1] sm:$0x3] }
 0x2ef   : > { %v242_v50 = vand.u32 1, %v241_v49  ;;  %v244_v52 = vand.u32 2, %v241_v49  ;;  %v246_v27 = vand.u32 4, %v241_v49  ;;  %v248_v28 = vand.u32 8, %v241_v49 }
 0x2f1   : > { %vm243_vm3 = vcmp.ne.s32.totalorder %v242_v50, 0  ;;  %vm245_vm4 = vcmp.ne.s32.totalorder %v244_v52, 0  ;;  %vm247_vm11 = vcmp.ne.s32.totalorder %v246_v27, 0  ;;  %vm249_vm12 = vcmp.ne.s32.totalorder %v248_v28, 0 }
 0x2f2   : > { %v441_v51 = vsel %vm243_vm3, 1, %v1205_v0  ;;  %v555_v60 = vsel %vm245_vm4, 1, %v1205_v0  ;;  %v468_v32 = vsel %vm247_vm11, 1, %v1205_v0  ;;  %v481_v33 = vsel %vm249_vm12, 1, %v1205_v0 }
 0x2f3   : > { %v449_v54 = vrot.slane %v441_v51, %v1385_v9  ;;  %v445_v55 = vrot.slane %v441_v51, %v1381_v7  ;;  %v563_v16 = vrot.slane %v555_v60, %v1385_v9  ;;  %v559_v17 = vrot.slane %v555_v60, %v1381_v7 }
 0x2f5   : > { %vm451_vm7 = vcmp.eq.s32.totalorder %v449_v54, 1  ;;  %vm450_vm8 = vcmp.eq.s32.totalorder %v445_v55, 1  ;;  %vm565_vm9 = vcmp.eq.s32.totalorder %v563_v16, 1  ;;  %vm564_vm10 = vcmp.eq.s32.totalorder %v559_v17, 1 }
 0x364   : > { %v415_v36 = vpop.permute.xlu1 %414 }
 0x365   : > { %v417_v37 = vadd.f32 %v415_v36, %v410_v34  ;;  %v418_v38 = vadd.f32 %v415_v36, %v411_v35  ;;  %v472_v35 = vrot.slane %v468_v32, %v1381_v7  ;;  %v476_v36 = vrot.slane %v468_v32, %v1385_v9 }
 0x367   : > { %vm419_vm1 = vcmp.gt.f32.partialorder %v417_v37, 0.0  ;;  %vm420_vm2 = vcmp.gt.f32.partialorder %v418_v38, 0.0  ;;  %v421_v39 = vmul.f32 0.2, %v417_v37  ;;  %v422_v40 = vmul.f32 0.2, %v418_v38 }
 0x368   : > { %vm1522_vm15 = vcmp.eq.s32.totalorder %v472_v35, 1 }
 0x369   : > { %v1435_v41 = vsel %vm420_vm2, %v418_v38, %v422_v40  ;;  %v1437_v42 = vsel %vm419_vm1, %v417_v37, %v421_v39  ;;  %v485_v37 = vrot.slane %v481_v33, %v1381_v7  ;;  %v489_v38 = vrot.slane %v481_v33, %v1385_v9 }
 0x36a   : > { %427 = vrot.lane.b32.xlu1 %v1435_v41, %s1211_s12  ;;  %425 = vrot.lane.b32.xlu0 %v1437_v42, %s1211_s12  ;;  %vm1526_vm1 = vcmp.eq.s32.totalorder %v476_v36, 1 }
 0x36b   : > { %vm1530_vm2 = vcmp.eq.s32.totalorder %v485_v37, 1  ;;  %vm1534_vm3 = vcmp.eq.s32.totalorder %v489_v38, 1 }
 0x36e   : > { %436 = vrot.lane.b32.xlu1 %v1435_v41, %s1213_s14  ;;  %434 = vrot.lane.b32.xlu0 %v1437_v42, %s1213_s14 }
 0x372   : > { %502 = vperm.xlu1 %1077, %v1429_v25   ;;  %496 = vperm.xlu0 %1076, %v1429_v25  }
 0x376   : > { %1078 = vset.pattern.permute.xlu1 %v1207_v3  ;;  %1079 = vset.pattern.permute.xlu0 %v1214_v43 }
 0x377   : > { %534 = vperm.xlu1 %1078, %v1429_v25   ;;  %540 = vperm.xlu0 %1079, %v1429_v25  }
 0x37b   : > { %1080 = vset.pattern.permute.xlu1 %v1206_v1  ;;  %1082 = vset.pattern.permute.xlu0 %v1215_v44 }
 0x37c   : > { %585 = vperm.xlu1 %1080, %v1429_v25   ;;  %510 = vperm.xlu0 %1082, %v1429_v25  }
 0x380   : > { %1081 = vset.pattern.permute.xlu1 %v1216_v45  ;;  %517 = vrot.lane.b32.xlu0 %v1437_v42, %s1217_s29 }
 0x381   : > { %591 = vperm.xlu1 %1081, %v1429_v25   ;;  %1085 = vset.pattern.permute.xlu0 %v1218_v46 }
 0x384   : > { %523 = vrot.lane.b32.xlu0 %v1437_v42, %s1219_s16 }
 0x385   : > { %1083 = vset.pattern.permute.xlu1 %v1220_v47 }
 0x386   : > { %548 = vperm.xlu1 %1083, %v1429_v25  }
 0x38a   : > { %1084 = vset.pattern.permute.xlu1 %v1221_v48 }
 0x38b   : > { %599 = vperm.xlu1 %1084, %v1429_v25  }
 0x38f   : > { %519 = vrot.lane.b32.xlu1 %v1435_v41, %s1217_s29 }
 0x390   : > { %1087 = vset.pattern.permute.xlu1 %v1205_v0 }
 0x393   : > { %525 = vrot.lane.b32.xlu1 %v1435_v41, %s1219_s16 }
 0x3dc   : > { %v428_v56 = vpop.permute.xlu1 %427  ;;  %v426_v57 = vpop.permute.xlu0 %425 }
 0x3dd   : > { %v432_v61 = vsel %vm431_vm5, %v426_v57, %v428_v56  ;;  %v433_v5 = vsel %vm431_vm5, %v428_v56, %v426_v57  ;;  %vm809_vm5 = vcmask 1043456  }
 0x3e0   : > { %v437_v58 = vpop.permute.xlu1 %436  ;;  %v435_v59 = vpop.permute.xlu0 %434 }
 0x3e1   : > { %v439_v62 = vsel %vm438_vm6, %v435_v59, %v437_v58  ;;  %v440_v63 = vsel %vm438_vm6, %v437_v58, %v435_v59  ;;  %vm822_vm6 = vcmask 3072  }
 0x3e2   : > { %v1481_v2 = vsel %vm451_vm7, %v440_v63, %v432_v61  ;;  %v1483_v6 = vsel %vm450_vm8, %v439_v62, %v433_v5  ;;  %v1495_v18 = vsel %vm565_vm9, %v432_v61, %v440_v63  ;;  %v1497_v19 = vsel %vm564_vm10, %v433_v5, %v439_v62 }
 0x3e3   : > { %456 = vrot.lane.b32.xlu1 %v1481_v2, %s1217_s29  ;;  %454 = vrot.lane.b32.xlu0 %v1483_v6, %s1217_s29 }
 0x3e7   : > { %463 = vrot.lane.b32.xlu1 %v1481_v2, %s1219_s16  ;;  %461 = vrot.lane.b32.xlu0 %v1483_v6, %s1219_s16 }
 0x3eb   : > { %570 = vrot.lane.b32.xlu1 %v1495_v18, %s1217_s29  ;;  %568 = vrot.lane.b32.xlu0 %v1497_v19, %s1217_s29 }
 0x3ef   : > { %576 = vrot.lane.b32.xlu1 %v1495_v18, %s1219_s16  ;;  %574 = vrot.lane.b32.xlu0 %v1497_v19, %s1219_s16 }
 0x3f1   : > { %v503_v20 = vpop.permute.xlu1 %502  ;;  %v497_v22 = vpop.permute.xlu0 %496 }
 0x3f3   : > { %609 = vperm.xlu0 %1085, %v1429_v25  }
 0x3f6   : > { %v535_v21 = vpop.permute.xlu1 %534  ;;  %v541_v24 = vpop.permute.xlu0 %540 }
 0x3f7   : > { %v543_v60 = vmul.f32 %v541_v24, %v1437_v42  ;;  %v544_v61 = vmul.f32 %v541_v24, %v1435_v41 }
 0x3fb   : > { %v1508_v23 = vpop.permute.xlu1 %585  ;;  %v511_v30 = vpop.permute.xlu0 %510 }
 0x3ff   : > { %v518_v34 = vpop.permute.xlu0 %517 }
 0x400   : > { %v1510_v26 = vpop.permute.xlu1 %591 }
 0x403   : > { %v524_v49 = vpop.permute.xlu0 %523 }
 0x405   : > { %v549_v29 = vpop.permute.xlu1 %548 }
 0x40a   : > { %v1512_v31 = vpop.permute.xlu1 %599 }
 0x40e   : > { %v520_v39 = vpop.permute.xlu1 %519 }
 0x40f   : > { %v521_v51 = vsel %vm458_vm13, %v518_v34, %v520_v39  ;;  %v522_v52 = vsel %vm458_vm13, %v520_v39, %v518_v34 }
 0x412   : > { %v526_v50 = vpop.permute.xlu1 %525 }
 0x413   : > { %v527_v54 = vsel %vm465_vm14, %v524_v49, %v526_v50  ;;  %v528_v55 = vsel %vm465_vm14, %v526_v50, %v524_v49  ;;  %v505_v49 = vmul.f32 %v503_v20, %v1483_v6  ;;  %v506_v50 = vmul.f32 %v503_v20, %v1481_v2 }
 0x414   : > { %v529_v56 = vsel %vm1522_vm15, %v527_v54, %v522_v52  ;;  %v530_v57 = vsel %vm1526_vm1, %v528_v55, %v521_v51  ;;  %v531_v58 = vsel %vm1530_vm2, %v522_v52, %v527_v54  ;;  %v532_v59 = vsel %vm1534_vm3, %v521_v51, %v528_v55 }
 0x415   : > { %v537_v5 = vmul.f32 %v535_v21, %v529_v56  ;;  %v538_v62 = vmul.f32 %v535_v21, %v530_v57  ;;  %v551_v63 = vmul.f32 %v549_v29, %v531_v58  ;;  %v552_v16 = vmul.f32 %v549_v29, %v532_v59 }
 0x417   : > { %v545_v17 = vadd.f32 %v543_v60, %v537_v5  ;;  %v546_v27 = vadd.f32 %v544_v61, %v538_v62 }
 0x419   : > { %v553_v28 = vadd.f32 %v551_v63, %v545_v17  ;;  %v554_v32 = vadd.f32 %v552_v16, %v546_v27  ;;  %v594_v27 = vmul.f32 %v1510_v26, %v1497_v19 }
 0x455   : > { %v457_v33 = vpop.permute.xlu1 %456  ;;  %v455_v34 = vpop.permute.xlu0 %454 }
 0x456   : > { %v459_v37 = vsel %vm458_vm13, %v455_v34, %v457_v33  ;;  %v460_v42 = vsel %vm458_vm13, %v457_v33, %v455_v34  ;;  %v595_v33 = vmul.f32 %v1510_v26, %v1495_v18 }
 0x459   : > { %v464_v35 = vpop.permute.xlu1 %463  ;;  %v462_v36 = vpop.permute.xlu0 %461 }
 0x45a   : > { %v466_v41 = vsel %vm465_vm14, %v462_v36, %v464_v35  ;;  %v467_v21 = vsel %vm465_vm14, %v464_v35, %v462_v36 }
 0x45b   : > { %v479_v24 = vsel %vm1522_vm15, %v466_v41, %v460_v42  ;;  %v480_v29 = vsel %vm1526_vm1, %v467_v21, %v459_v37  ;;  %v492_v38 = vsel %vm1530_vm2, %v460_v42, %v466_v41  ;;  %v493_v39 = vsel %vm1534_vm3, %v459_v37, %v467_v21 }
 0x45c   : > { %v499_v51 = vmul.f32 %v497_v22, %v479_v24  ;;  %v500_v52 = vmul.f32 %v497_v22, %v480_v29  ;;  %v513_v58 = vmul.f32 %v511_v30, %v492_v38  ;;  %v514_v59 = vmul.f32 %v511_v30, %v493_v39 }
 0x45d   : > { %v571_v54 = vpop.permute.xlu1 %570  ;;  %v569_v55 = vpop.permute.xlu0 %568 }
 0x45e   : > { %v507_v56 = vadd.f32 %v505_v49, %v499_v51  ;;  %v508_v57 = vadd.f32 %v506_v50, %v500_v52  ;;  %v572_v63 = vsel %vm458_vm13, %v569_v55, %v571_v54  ;;  %v573_v6 = vsel %vm458_vm13, %v571_v54, %v569_v55 }
 0x460   : > { %v515_v60 = vadd.f32 %v513_v58, %v507_v56  ;;  %v516_v61 = vadd.f32 %v514_v59, %v508_v57 }
 0x461   : > { %v577_v5 = vpop.permute.xlu1 %576  ;;  %v575_v62 = vpop.permute.xlu0 %574 }
 0x462   : > { %v578_v2 = vsel %vm465_vm14, %v575_v62, %v577_v5  ;;  %v579_v20 = vsel %vm465_vm14, %v577_v5, %v575_v62 }
 0x463   : > { %v580_v22 = vsel %vm1522_vm15, %v578_v2, %v573_v6  ;;  %v581_v30 = vsel %vm1526_vm1, %v579_v20, %v572_v63  ;;  %v582_v16 = vsel %vm1530_vm2, %v573_v6, %v578_v2  ;;  %v583_v17 = vsel %vm1534_vm3, %v572_v63, %v579_v20 }
 0x464   : > { %v588_v53 = vmul.f32 %v1508_v23, %v580_v22  ;;  %v589_v40 = vmul.f32 %v1508_v23, %v581_v30  ;;  %v602_v0 = vmul.f32 %v1512_v31, %v582_v16  ;;  %v603_v46 = vmul.f32 %v1512_v31, %v583_v17  ;;  %v252_v17 = vld [vmem:[%s1714_s3] sm:$0xf] }
 0x466   : > { %v596_v34 = vadd.f32 %v594_v27, %v588_v53  ;;  %v597_v35 = vadd.f32 %v595_v33, %v589_v40  ;;  %v1223_v27 = vmov 13  }
 0x468   : > { %v604_v36 = vadd.f32 %v602_v0, %v596_v34  ;;  %v605_v37 = vadd.f32 %v603_v46, %v597_v35 }
 0x46a   : > { %v607_v48 = vadd.f32 %v605_v37, %v516_v61  ;;  %v606_v42 = vadd.f32 %v604_v36, %v515_v60  ;;  %v1222_v61 = vmov 12  }
 0x46b   : > { %1086 = vset.pattern.permute.xlu0 %v1222_v61 }
 0x472   : > { %v610_v41 = vpop.permute.xlu0 %609 }
 0x473   : > { %v612_v21 = vadd.f32 %v610_v41, %v553_v28  ;;  %v613_v19 = vadd.f32 %v610_v41, %v554_v32 }
 0x475   : > { %v1598_v24 = vadd.f32 %v612_v21, %v606_v42  ;;  %v1600_v18 = vadd.f32 %v613_v19, %v607_v48 }
 0x477   : > { %v616_v23 = vadd.f32 %v1600_v18, %v1598_v24  ;;  %v619_v26 = vmul.f32 %v1598_v24, %v1598_v24  ;;  %v620_v31 = vmul.f32 %v1600_v18, %v1600_v18 }
 0x479   : > { %617 = vadd.xlane.f32.xlu1 %v616_v23  ;;  %v621_v29 = vadd.f32 %v620_v31, %v619_v26 }
 0x47b   : > { %622 = vadd.xlane.f32.xlu0 %v621_v29 }
 0x506   : > { %v618_v38 = vpop.xlane.xlu1 %617 }
 0x507   : > { %v624_v28 = vsel %vm366_vm0, %v618_v38, 0.0 }
 0x508   : > { %v623_v32 = vpop.xlane.xlu0 %622  ;;  %625 = vadd.xlane.f32.xlu1 %v624_v28 }
 0x509   : > { %v635_v39 = vsel %vm366_vm0, %v623_v32, 0.0 }
 0x50a   : > { %636 = vadd.xlane.f32.xlu0 %v635_v39 }
 0x595   : > { %v626_v49 = vpop.xlane.xlu1 %625 }
 0x596   : > { %v627_v50 = vrot.slane %v626_v49, 4 }
 0x597   : > { %v637_v51 = vpop.xlane.xlu0 %636 }
 0x598   : > { %v628_v52 = vadd.f32 %v627_v50, %v626_v49  ;;  %v638_v54 = vrot.slane %v637_v51, 4 }
 0x59a   : > { %v629_v55 = vrot.slane %v628_v52, 2  ;;  %v639_v56 = vadd.f32 %v638_v54, %v637_v51 }
 0x59c   : > { %v640_v57 = vrot.slane %v639_v56, 2  ;;  %v630_v58 = vadd.f32 %v629_v55, %v628_v52 }
 0x59e   : > { %v631_v59 = vrot.slane %v630_v58, 1  ;;  %v641_v60 = vadd.f32 %v640_v57, %v639_v56 }
 0x5a0   : > { %v632_v5 = vadd.f32 %v631_v59, %v630_v58  ;;  %v642_v62 = vrot.slane %v641_v60, 1 }
 0x5a2   : > { %991 = vpush %v632_v5  ;;  %v643_v63 = vadd.f32 %v642_v62, %v641_v60 }
 0x5a4   : > { %993 = vpush %v643_v63 }
 0x5d3   : > { %s992_s28 = spop %991 }
 0x5d4   : > { %s634_s8 = smul.f32 0.00048828125, %s992_s28 }
 0x5d5   : > { %s994_s9 = spop %993 }
 0x5d6   : > { %s646_s10 = smul.f32 %s634_s8, %s634_s8  ;;  %v655_v30 = vstv %s634_s8 }
 0x5d7   : > { %s645_s11 = smul.f32 0.00048828125, %s994_s9 }
 0x5d9   : > { %s647_s23 = ssub.f32 %s645_s11, %s646_s10 }
 0x5db   : > { %s648_s15 = smax.f32 %s1210_s7, %s647_s23 }
 0x5dc   : > { %s649_s14 = sadd.f32 1e-05, %s648_s15 }
 0x5de   : > { %v650_v6 = vstv %s649_s14 }
 0x5df   : > { %1102 = vrsqrt.f32 %v650_v6 }
 0x5e9   : > { %v1103_v2 = vpop.eup %1102 }
 0x5ea   : > { %995 = vpush %v1103_v2 }
 0x61b   : > { %s996_s29 = spop %995 }
 0x61c   : > { %v653_v20 = vstv %s996_s29 }
 0x61d   : > { %v654_v22 = vmul.f32 %v653_v20, %v1429_v25 }
 0x61f   : > { %v656_v16 = vmul.f32 %v655_v30, %v654_v22  ;;  %664 = vperm.xlu0 %1086, %v654_v22  }
 0x621   : > { %658 = vrot.lane.b32.xlu1 %v656_v16, %s1211_s12 }
 0x623   : > { %1095 = vset.pattern.permute.xlu0 %v1220_v47 }
 0x624   : > { %794 = vperm.xlu0 %1095, %v252_v17  }
 0x625   : > { %684 = vperm.xlu1 %1087, %v252_v17  }
 0x629   : > { %1088 = vset.pattern.permute.xlu1 %v1207_v3 }
 0x62a   : > { %698 = vperm.xlu1 %1088, %v252_v17  }
 0x62e   : > { %1089 = vset.pattern.permute.xlu1 %v1223_v27 }
 0x693   : > { %v659_v33 = vpop.permute.xlu1 %658 }
 0x694   : > { %v661_v53 = vsub.f32 %v1429_v25, %v659_v33 }
 0x696   : > { %671 = vperm.xlu1 %1089, %v661_v53  }
 0x69a   : > { %1090 = vset.pattern.permute.xlu1 %v1206_v1 }
 0x69b   : > { %714 = vperm.xlu1 %1090, %v252_v17  }
 0x69e   : > { %v665_v40 = vpop.permute.xlu0 %664 }
 0x69f   : > { %1091 = vset.pattern.permute.xlu1 %v1208_v4  ;;  %v667_v34 = vmul.f32 %v665_v40, %v1598_v24  ;;  %v668_v1 = vmul.f32 %v665_v40, %v1600_v18 }
 0x6a0   : > { %730 = vperm.xlu1 %1091, %v252_v17  }
 0x6a3   : > { %v795_v22 = vpop.permute.xlu0 %794 }
 0x6a4   : > { %1092 = vset.pattern.permute.xlu1 %v1214_v43  ;;  %v685_v3 = vpop.permute.xlu1 %684 }
 0x6a5   : > { %746 = vperm.xlu1 %1092, %v252_v17  }
 0x6a9   : > { %1093 = vset.pattern.permute.xlu1 %v1216_v45  ;;  %v699_v47 = vpop.permute.xlu1 %698 }
 0x6aa   : > { %762 = vperm.xlu1 %1093, %v252_v17  }
 0x6ae   : > { %1094 = vset.pattern.permute.xlu1 %v1215_v44 }
 0x6af   : > { %778 = vperm.xlu1 %1094, %v252_v17  }
 0x715   : > { %v672_v35 = vpop.permute.xlu1 %671 }
 0x716   : > { %v674_v0 = vadd.f32 %v672_v35, %v667_v34  ;;  %v675_v4 = vadd.f32 %v672_v35, %v668_v1 }
 0x718   : > { %vm676_vm0 = vcmp.gt.f32.partialorder %v674_v0, 0.0  ;;  %vm677_vm4 = vcmp.gt.f32.partialorder %v675_v4, 0.0  ;;  %v678_v43 = vmul.f32 0.2, %v674_v0  ;;  %v679_v46 = vmul.f32 0.2, %v675_v4 }
 0x71a   : > { %v680_v36 = vsel %vm676_vm0, %v674_v0, %v678_v43  ;;  %v681_v45 = vsel %vm677_vm4, %v675_v4, %v679_v46  ;;  %v715_v37 = vpop.permute.xlu1 %714 }
 0x71b   : > { %v690_v44 = vrot.slane %v680_v36, %v1381_v7  ;;  %v694_v48 = vrot.slane %v681_v45, %v1381_v7  ;;  %v704_v42 = vrot.slane %v680_v36, %v1385_v9  ;;  %v708_v41 = vrot.slane %v681_v45, %v1385_v9 }
 0x71c   : > { %v720_v26 = vrot.slane %v680_v36, %v1391_v12  ;;  %v724_v31 = vrot.slane %v681_v45, %v1391_v12  ;;  %v736_v7 = vrot.slane %v680_v36, %v1395_v14  ;;  %v740_v49 = vrot.slane %v681_v45, %v1395_v14 }
 0x71d   : > { %v695_v21 = vmul.f32 %v690_v44, %v685_v3  ;;  %v696_v19 = vmul.f32 %v694_v48, %v685_v3  ;;  %v709_v24 = vmul.f32 %v704_v42, %v699_v47  ;;  %v710_v18 = vmul.f32 %v708_v41, %v699_v47 }
 0x71e   : > { %v725_v32 = vmul.f32 %v720_v26, %v715_v37  ;;  %v726_v39 = vmul.f32 %v724_v31, %v715_v37  ;;  %v752_v9 = vrot.slane %v680_v36, %v1383_v8  ;;  %v756_v50 = vrot.slane %v681_v45, %v1383_v8 }
 0x71f   : > { %v731_v23 = vpop.permute.xlu1 %730  ;;  %v711_v29 = vadd.f32 %v709_v24, %v695_v21  ;;  %v712_v38 = vadd.f32 %v710_v18, %v696_v19  ;;  %v768_v12 = vrot.slane %v680_v36, %v1387_v10  ;;  %v772_v58 = vrot.slane %v681_v45, %v1387_v10 }
 0x720   : > { %v741_v54 = vmul.f32 %v736_v7, %v731_v23  ;;  %v742_v55 = vmul.f32 %v740_v49, %v731_v23  ;;  %v800_v14 = vrot.slane %v680_v36, %v1397_v15  ;;  %v804_v63 = vrot.slane %v681_v45, %v1397_v15 }
 0x721   : > { %v727_v51 = vadd.f32 %v725_v32, %v711_v29  ;;  %v728_v52 = vadd.f32 %v726_v39, %v712_v38  ;;  %v784_v2 = vrot.slane %v680_v36, %v1393_v13  ;;  %v788_v20 = vrot.slane %v681_v45, %v1393_v13 }
 0x722   : > { %v805_v33 = vmul.f32 %v800_v14, %v795_v22  ;;  %v806_v53 = vmul.f32 %v804_v63, %v795_v22  ;;  %v1224_v32 = vmov 14  }
 0x723   : > { %v743_v60 = vadd.f32 %v741_v54, %v727_v51  ;;  %v744_v61 = vadd.f32 %v742_v55, %v728_v52  ;;  %1096 = vset.pattern.permute.xlu0 %v1224_v32 }
 0x724   : > { %v747_v28 = vpop.permute.xlu1 %746 }
 0x725   : > { %v757_v56 = vmul.f32 %v752_v9, %v747_v28  ;;  %v758_v57 = vmul.f32 %v756_v50, %v747_v28  ;;  %v1225_v9 = vmov 15  }
 0x726   : > { %1097 = vset.pattern.permute.xlu1 %v1225_v9 }
 0x727   : > { %v759_v8 = vadd.f32 %v757_v56, %v743_v60  ;;  %v760_v6 = vadd.f32 %v758_v57, %v744_v61 }
 0x729   : > { %v763_v59 = vpop.permute.xlu1 %762 }
 0x72a   : > { %v773_v5 = vmul.f32 %v768_v12, %v763_v59  ;;  %v774_v62 = vmul.f32 %v772_v58, %v763_v59  ;;  %v875_v59 = vcombine.high %v1389_v11, %v1389_v11 }
 0x72c   : > { %v775_v16 = vadd.f32 %v773_v5, %v759_v8  ;;  %v776_v17 = vadd.f32 %v774_v62, %v760_v6 }
 0x72e   : > { %v779_v30 = vpop.permute.xlu1 %778 }
 0x72f   : > { %v789_v10 = vmul.f32 %v784_v2, %v779_v30  ;;  %v790_v27 = vmul.f32 %v788_v20, %v779_v30 }
 0x731   : > { %v791_v3 = vadd.f32 %v789_v10, %v775_v16  ;;  %v792_v47 = vadd.f32 %v790_v27, %v776_v17 }
 0x733   : > { %v1642_v40 = vadd.f32 %v805_v33, %v791_v3  ;;  %v1644_v15 = vadd.f32 %v806_v53, %v792_v47 }
 0x735   : > { %v810_v34 = vsel %vm809_vm5, %v1642_v40, 0.0  ;;  %v811_v1 = vsel %vm809_vm5, %v1644_v15, 0.0  ;;  %v815_v13 = vmul.f32 %v1642_v40, %v1642_v40  ;;  %v816_v35 = vmul.f32 %v1644_v15, %v1644_v15 }
 0x736   : > { %v812_v0 = vadd.f32 %v811_v1, %v810_v34 }
 0x737   : > { %v817_v4 = vsel %vm809_vm5, %v815_v13, 0.0  ;;  %v818_v43 = vsel %vm809_vm5, %v816_v35, 0.0 }
 0x738   : > { %813 = vadd.xlane.f32.xlu1 %v812_v0  ;;  %v819_v46 = vadd.f32 %v818_v43, %v817_v4 }
 0x73a   : > { %820 = vadd.xlane.f32.xlu0 %v819_v46 }
 0x7c5   : > { %v814_v36 = vpop.xlane.xlu1 %813 }
 0x7c6   : > { %v823_v45 = vsel %vm822_vm6, %v814_v36, 0.0 }
 0x7c7   : > { %v821_v37 = vpop.xlane.xlu0 %820  ;;  %824 = vadd.xlane.f32.xlu1 %v823_v45 }
 0x7c8   : > { %v834_v44 = vsel %vm822_vm6, %v821_v37, 0.0 }
 0x7c9   : > { %835 = vadd.xlane.f32.xlu0 %v834_v44 }
 0x854   : > { %v825_v48 = vpop.xlane.xlu1 %824 }
 0x855   : > { %v826_v42 = vrot.slane %v825_v48, 4 }
 0x856   : > { %v836_v41 = vpop.xlane.xlu0 %835 }
 0x857   : > { %v827_v21 = vadd.f32 %v826_v42, %v825_v48  ;;  %v837_v19 = vrot.slane %v836_v41, 4 }
 0x859   : > { %v828_v24 = vrot.slane %v827_v21, 2  ;;  %v838_v18 = vadd.f32 %v837_v19, %v836_v41 }
 0x85b   : > { %v839_v23 = vrot.slane %v838_v18, 2  ;;  %v829_v26 = vadd.f32 %v828_v24, %v827_v21 }
 0x85d   : > { %v830_v31 = vrot.slane %v829_v26, 1  ;;  %v840_v29 = vadd.f32 %v839_v23, %v838_v18 }
 0x85f   : > { %v831_v38 = vadd.f32 %v830_v31, %v829_v26  ;;  %v841_v28 = vrot.slane %v840_v29, 1 }
 0x861   : > { %997 = vpush %v831_v38  ;;  %v842_v39 = vadd.f32 %v841_v28, %v840_v29 }
 0x863   : > { %999 = vpush %v842_v39 }
 0x892   : > { %s998_s26 = spop %997 }
 0x893   : > { %s833_s28 = smul.f32 0.0009765625, %s998_s26 }
 0x894   : > { %s1000_s8 = spop %999 }
 0x895   : > { %s845_s9 = smul.f32 %s833_s28, %s833_s28  ;;  %v854_v52 = vstv %s833_s28  ;;  %s885_s28 = scalar_lea.sflag [#allocation4], %s1362_s13 }
 0x896   : > { %s844_s10 = smul.f32 0.0009765625, %s1000_s8 }
 0x898   : > { %s846_s11 = ssub.f32 %s844_s10, %s845_s9 }
 0x89a   : > { %s847_s23 = smax.f32 %s1210_s7, %s846_s11  ;;  %s984_s7 = sshll.u32 %s1278_s22, 7 }
 0x89b   : > { %s848_s15 = sadd.f32 1e-05, %s847_s23  ;;  %s1667_s26 = scalar_lea.hbm %s1716_s5, %s984_s7 }
 0x89d   : > { %v849_v7 = vstv %s848_s15 }
 0x89e   : > { %1104 = vrsqrt.f32 %v849_v7 }
 0x8a8   : > { %v1105_v49 = vpop.eup %1104 }
 0x8a9   : > { %1001 = vpush %v1105_v49 }
 0x8da   : > { %s1002_s14 = spop %1001 }
 0x8db   : > { %v852_v50 = vstv %s1002_s14 }
 0x8dc   : > { %v853_v51 = vmul.f32 %v852_v50, %v1429_v25 }
 0x8de   : > { %v855_v54 = vmul.f32 %v854_v52, %v853_v51  ;;  %863 = vperm.xlu0 %1096, %v853_v51  }
 0x8e0   : > { %857 = vrot.lane.b32.xlu1 %v855_v54, %s1211_s12  ;;  %s240_s12 = scalar_lea.vmem [#allocation5], %s976_s17  ;;  %s1226_s17 = smov [#allocation5]  }
 0x8e1   : > { %s899_s29 = sshll.u32 %s240_s12, 4  ;;  %s1140_s8 = sshll.u32 %s1226_s17, 4  ;;  %s1669_s29 = int_to_ptr.vmem [resolvable:$true] %s899_s29  ;;  %s1141_s8 = int_to_ptr.vmem [resolvable:$false] %s1140_s8 }
 0x8e2   : > { %1098 = vset.pattern.permute.xlu0 %v1225_v9  ;;  %s1136_s22 = scalar_lea.vmem %s1669_s29, 128  ;;  %s1142_s9 = scalar_lea.vmem %s1141_s8, 256 }
 0x8e3   : > { %p1137_p6 = scmp.ne.s32.totalorder %s1669_s29, %s1136_s22  ;;  %p1143_p7 = scmp.lt.s32.totalorder %s1669_s29, %s1141_s8 }
 0x8e4   : > { %p1144_p10 = scmp.lt.s32.totalorder %s1142_s9, %s1136_s22 }
 0x8e5   : > { %p1138_p12 = pnand %p1137_p6, %p1733_p11 }
 0x8e6   : > { %p1145_p2 = por %p1144_p10, %p1143_p7 }
 0x8e7   : > { %p1139_p13 = pneg %p1138_p12 }
 0x8e9   : > { %p1146_p4 = pnand %p1145_p2, %p1139_p13 }
 0x952   : > { %v858_v55 = vpop.permute.xlu1 %857 }
 0x953   : > { %v860_v56 = vsub.f32 %v1429_v25, %v858_v55 }
 0x955   : > { %870 = vperm.xlu1 %1097, %v860_v56  }
 0x95d   : > { %v864_v57 = vpop.permute.xlu0 %863 }
 0x95e   : > { %v866_v12 = vmul.f32 %v864_v57, %v1642_v40  ;;  %v867_v58 = vmul.f32 %v864_v57, %v1644_v15 }
 0x9d4   : > { %v871_v60 = vpop.permute.xlu1 %870 }
 0x9d5   : > { %v873_v61 = vadd.f32 %v871_v60, %v866_v12  ;;  %v874_v5 = vadd.f32 %v871_v60, %v867_v58 }
 0x9d7   : > { %v877_v25 = vadd.f32 %v873_v61, %v1389_v11  ;;  %v878_v62 = vadd.f32 %v875_v59, %v874_v5 }
 0x9d9   : > { %v881_v14 = vcombine.low %v877_v25, %v878_v62 }
 0x9db   : > { %883 = vst [vmem:[%s240_s12] sm:$0xff] %v881_v14 }
 0x9dc   : > { %1149 = shalt.err (!%p1146_p4)
}
 0x9dd   : > { %s1150_s13 = scalar_lea.hbm %s1667_s26, 128  ;;  %s1154_s23 = scalar_lea.hbm %s1716_s5, 256 }
 0x9de   : > { %p1151_p5 = scmp.ne.s32.totalorder %s1667_s26, %s1150_s13  ;;  %p1155_p0 = scmp.lt.u32.totalorder %s1667_s26, %s1716_s5 }
 0x9df   : > { %p1156_p1 = scmp.lt.u32.totalorder %s1154_s23, %s1150_s13  ;;  %p1158_p6 = scmp.lt.u32.totalorder %s1150_s13, %s1667_s26 }
 0x9e0   : > { %p1152_p8 = pnand %p1151_p5, %p1733_p11 }
 0x9e1   : > { %p1157_p3 = por %p1156_p1, %p1155_p0 }
 0x9e2   : > { %p1153_p9 = pneg %p1152_p8 }
 0x9e3   : > { %p1159_p12 = por %p1158_p6, %p1157_p3 }
 0x9e5   : > { %p1160_p13 = pnand %p1159_p12, %p1153_p9 }
 0x9e7   : > { %1163 = shalt.err (!%p1160_p13)
}
 0x9e8   : > { %1005 = dma.vmem_to_hbm [thread:$0]  (%p1733_p11), %s1669_s29, 128, %s1667_s26, %s885_s28  }
 0x9e9 PF: > { %s911_s7 = sand.u32 1, %s1190_s18   ;;  %p1734_p7 = scmp.ne.s32.totalorder %s1721_s6, 0 }
 0x9ea   : > { %p1735_p10 = scmp.ge.s32.totalorder %s1202_s21, 2  ;;  %s912_s12 = scalar_lea.sflag [#allocation4], %s911_s7 }
 0x9ec   : > { %p1012_p2 = pnand %p1735_p10, %p1734_p7 }
 0x9ee   : > { %1185 = dma.done.wait (!%p1012_p2), %s912_s12, 128  }
 0x9ef   : > { %1187 = vsyncadd (!%p1012_p2), %s912_s12, 4294967168  ;;  %p18_p4 = scmp.ge.s32.totalorder %s1282_s24, 4   ;;  %s1736_s18 = smov %s1194_s19 }
 0x9f0   : > { %s1737_s19 = smov %s1198_s20  ;;  %s1738_s20 = smov %s1294_s27 }
 0x9f1   : > { %s1739_s21 = smov %s1282_s24  ;;  %20 = sbr.rel (!%p18_p4) target bundleno = 5 (0x5), region = 85 }
 0x9f8   :  { %917 = vsyncpa [#allocation3], 1 }
 0x9f9   :  { %919 = vsyncpa [#allocation3 + $0x1], 1 }
 0x9fa   :  { %920 = vsyncpa [#allocation4], 1 }
 0x9fb   :  { %922 = vsyncpa [#allocation4 + $0x1], 1 }

</bundles_post_ra>
